<compile_context>
chip_gen: v7x
topology: tpu7x:2x2x1
jax: 0.10.0
libtpu: 0.0.40
codegen_flags: <defaults>
</compile_context>

<pallas_src>
import functools

import jax
import jax.numpy as jnp
from jax import lax
from jax.experimental import pallas as pl
from jax.experimental.pallas import tpu as pltpu


# ----------------------------------------------------------------------------
# In-kernel helpers
# ----------------------------------------------------------------------------
def _lrelu(y):
    return jnp.where(y > 0, y, 0.2 * y)


def _shift_with_zero_fill(a, d):
    """out[:, p] = a[:, p + d] when p + d in range, else 0 (flat spatial axis)."""
    hw = a.shape[-1]
    if d == 0:
        return a
    z = jnp.zeros((a.shape[0], abs(d)), a.dtype)
    if d > 0:
        return jnp.concatenate([a[:, d:], z], axis=1)
    return jnp.concatenate([z, a[:, :hw + d]], axis=1)


def _conv3x3_im2col(a, w_ref, s, b, H, W):
    """3x3 'padding=1' conv + folded-BN scale/shift + LeakyReLU(0.2).

    a     : (Cin, H*W) f32, row-major spatial flattened on the lane axis.
    w_ref : (Cout, 9*Cin) bf16, tap-major (ky, kx) then Cin.
    s, b  : (Cout, 1) f32 folded BatchNorm scale / shift (conv bias included).
    returns (Cout, H*W) f32.
    """
    hw = H * W
    col = lax.broadcasted_iota(jnp.int32, (1, hw), 1) % W  # x-coordinate per lane
    taps = []
    for oy in (-1, 0, 1):
        for ox in (-1, 0, 1):
            t = _shift_with_zero_fill(a, oy * W + ox)
            # Row-wrap contamination from horizontal shifts; vertical out-of-range
            # positions are already zero-filled by the flat shift.
            if ox == 1:
                t = jnp.where(col < (W - 1), t, 0.0)
            elif ox == -1:
                t = jnp.where(col >= 1, t, 0.0)
            taps.append(t)
    slab = jnp.concatenate(taps, axis=0).astype(jnp.bfloat16)   # (9*Cin, H*W)
    y = jnp.dot(w_ref[...], slab, preferred_element_type=jnp.float32)
    return _lrelu(y * s + b)


# ----------------------------------------------------------------------------
# Fused RIRBDecoder kernel: one grid step per batch element
# ----------------------------------------------------------------------------
def _rirb_decoder_kernel(x_ref,
                         w0_ref, s0_ref, b0_ref,
                         w1_ref, s1_ref, b1_ref,
                         w2_ref, s2_ref, b2_ref,
                         w3_ref, s3_ref, b3_ref,
                         w4_ref, s4_ref, b4_ref,
                         o_ref, *, H, W):
    x = x_ref[0].astype(jnp.float32)                            # (Cin, H*W)

    # Decoder conv: 3x3 -> BN -> LeakyReLU
    d1 = _conv3x3_im2col(x, w0_ref, s0_ref[...], b0_ref[...], H, W)

    # RIRB block (bn1 shared by conv1/conv2/conv3 -> same BN params, per-conv bias)
    o1 = _conv3x3_im2col(d1, w1_ref, s1_ref[...], b1_ref[...], H, W)
    o2 = _lrelu(jnp.dot(w2_ref[...], o1.astype(jnp.bfloat16),
                        preferred_element_type=jnp.float32)
                * s2_ref[...] + b2_ref[...])
    o3 = _lrelu(jnp.dot(w3_ref[...], o2.astype(jnp.bfloat16),
                        preferred_element_type=jnp.float32)
                * s3_ref[...] + b3_ref[...])
    r1 = o1 + o3
    o4 = _conv3x3_im2col(r1, w4_ref, s4_ref[...], b4_ref[...], H, W)

    o_ref[0] = (d1 + o4).astype(o_ref.dtype)                    # residual: input of RIRB


# ----------------------------------------------------------------------------
# Wrapper: BN folding, weight re-layout, pallas_call
# ----------------------------------------------------------------------------
def _fold_bn(conv_bias, gamma, beta, mean, var, eps=1e-5):
    # conv(x)+b then BN(eval): gamma*(z+b-mean)/sqrt(var+eps)+beta = z*scale+shift
    scale = gamma / jnp.sqrt(var + eps)
    shift = (conv_bias - mean) * scale + beta
    return scale[:, None].astype(jnp.float32), shift[:, None].astype(jnp.float32)


def rirb_decoder_forward(x_nchw, params, eps=1e-5):
    N, Cin, H, W = x_nchw.shape
    Cout = params['w0'].shape[0]
    Cmid = Cout // 2
    HW = H * W

    def mat3(w):  # OIHW (Co,Ci,3,3) -> (Co, 9*Ci) bf16, tap-major (ky,kx) then Ci
        co, ci = w.shape[0], w.shape[1]
        return jnp.transpose(w, (0, 2, 3, 1)).reshape(co, 9 * ci).astype(jnp.bfloat16)

    def mat1(w):  # (Co,Ci,1,1) -> (Co,Ci) bf16
        return w[:, :, 0, 0].astype(jnp.bfloat16)

    w0, w1, w4 = mat3(params['w0']), mat3(params['w1']), mat3(params['w4'])
    w2, w3 = mat1(params['w2']), mat1(params['w3'])

    s0, b0 = _fold_bn(params['cb0'], params['g0'], params['be0'], params['m0'], params['v0'], eps)
    s1, b1 = _fold_bn(params['cb1'], params['g1'], params['be1'], params['m1'], params['v1'], eps)
    s2, b2 = _fold_bn(params['cb2'], params['g1'], params['be1'], params['m1'], params['v1'], eps)
    s3, b3 = _fold_bn(params['cb3'], params['g1'], params['be1'], params['m1'], params['v1'], eps)
    s4, b4 = _fold_bn(params['cb4'], params['g2'], params['be2'], params['m2'], params['v2'], eps)

    x_flat = x_nchw.reshape(N, Cin, HW)   # free reshape: NCHW kept, spatial on lanes

    kernel = functools.partial(_rirb_decoder_kernel, H=H, W=W)
    full = lambda n: (0, 0)

    out_flat = pl.pallas_call(
        kernel,
        out_shape=jax.ShapeDtypeStruct((N, Cout, HW), x_nchw.dtype),
        grid_spec=pltpu.PrefetchScalarGridSpec(
            num_scalar_prefetch=0,
            grid=(N,),
            in_specs=[
                pl.BlockSpec((1, Cin, HW), lambda n: (n, 0, 0)),
                pl.BlockSpec((Cout, 9 * Cin), full),   # w0
                pl.BlockSpec((Cout, 1), full),         # s0
                pl.BlockSpec((Cout, 1), full),         # b0
                pl.BlockSpec((Cmid, 9 * Cout), full),  # w1
                pl.BlockSpec((Cmid, 1), full),         # s1
                pl.BlockSpec((Cmid, 1), full),         # b1
                pl.BlockSpec((Cmid, Cmid), full),      # w2
                pl.BlockSpec((Cmid, 1), full),         # s2
                pl.BlockSpec((Cmid, 1), full),         # b2
                pl.BlockSpec((Cmid, Cmid), full),      # w3
                pl.BlockSpec((Cmid, 1), full),         # s3
                pl.BlockSpec((Cmid, 1), full),         # b3
                pl.BlockSpec((Cout, 9 * Cmid), full),  # w4
                pl.BlockSpec((Cout, 1), full),         # s4
                pl.BlockSpec((Cout, 1), full),         # b4
            ],
            out_specs=pl.BlockSpec((1, Cout, HW), lambda n: (n, 0, 0)),
        ),
        compiler_params=pltpu.CompilerParams(
            dimension_semantics=("parallel",)),        # batch axis -> both v7x TCs
    )(x_flat, w0, s0, b0, w1, s1, b1, w2, s2, b2, w3, s3, b3, w4, s4, b4)

    return out_flat.reshape(N, Cout, H, W)


# ----------------------------------------------------------------------------
# Deterministic synthetic parameters (PyTorch OIHW layout, eval-mode BN stats)
# ----------------------------------------------------------------------------
def make_params(key, cin, cout):
    cmid = cout // 2
    keys = iter(jax.random.split(key, 30))

    def nrm(shape, s=0.1):
        return jax.random.normal(next(keys), shape, jnp.float32) * s

    def uni(shape):
        return jax.random.uniform(next(keys), shape, jnp.float32, 0.5, 1.5)

    p = {}
    # decoder conv + its BN
    p['w0'], p['cb0'] = nrm((cout, cin, 3, 3)), nrm((cout,))
    p['g0'], p['be0'], p['m0'], p['v0'] = uni((cout,)), nrm((cout,)), nrm((cout,)), uni((cout,))
    # RIRB convs
    p['w1'], p['cb1'] = nrm((cmid, cout, 3, 3)), nrm((cmid,))
    p['w2'], p['cb2'] = nrm((cmid, cmid, 1, 1)), nrm((cmid,))
    p['w3'], p['cb3'] = nrm((cmid, cmid, 1, 1)), nrm((cmid,))
    p['w4'], p['cb4'] = nrm((cout, cmid, 3, 3)), nrm((cout,))
    # bn1 (cmid, shared by conv1/2/3) and bn2 (cout)
    p['g1'], p['be1'], p['m1'], p['v1'] = uni((cmid,)), nrm((cmid,)), nrm((cmid,)), uni((cmid,))
    p['g2'], p['be2'], p['m2'], p['v2'] = uni((cout,)), nrm((cout,)), nrm((cout,)), uni((cout,))
    return p


# ----------------------------------------------------------------------------
# Pure-JAX f32 reference (for verification)
# ----------------------------------------------------------------------------
def _ref_forward(x, p, eps=1e-5):
    def conv(h, w, b):
        y = lax.conv_general_dilated(h, w, window_strides=(1, 1), padding='SAME',
                                     dimension_numbers=('NCHW', 'OIHW', 'NCHW'))
        return y + b[None, :, None, None]

    def bn(y, g, be, m, v):
        return (g[None, :, None, None] * (y - m[None, :, None, None])
                / jnp.sqrt(v[None, :, None, None] + eps) + be[None, :, None, None])

    def lrelu(y):
        return jnp.where(y > 0, y, 0.2 * y)

    d1 = lrelu(bn(conv(x, p['w0'], p['cb0']), p['g0'], p['be0'], p['m0'], p['v0']))
    o1 = lrelu(bn(conv(d1, p['w1'], p['cb1']), p['g1'], p['be1'], p['m1'], p['v1']))
    o2 = lrelu(bn(conv(o1, p['w2'], p['cb2']), p['g1'], p['be1'], p['m1'], p['v1']))
    o3 = lrelu(bn(conv(o2, p['w3'], p['cb3']), p['g1'], p['be1'], p['m1'], p['v1']))
    r1 = o1 + o3
    o4 = lrelu(bn(conv(r1, p['w4'], p['cb4']), p['g2'], p['be2'], p['m2'], p['v2']))
    return d1 + o4


# ----------------------------------------------------------------------------
if __name__ == "__main__":
    key = jax.random.PRNGKey(0)
    kx, kp = jax.random.split(key)

    # RIRBDecoder(inchannels=4, outchannels=8), attName='' (no attention)
    N, Cin, Cout, H, W = 2, 4, 8, 16, 16
    x = jax.random.normal(kx, (N, Cin, H, W), jnp.float32)
    params = make_params(kp, Cin, Cout)

    out = jax.block_until_ready(rirb_decoder_forward(x, params))
    ref = jax.block_until_ready(_ref_forward(x, params))

    assert out.shape == (N, Cout, H, W)
    err = float(jnp.max(jnp.abs(out - ref)))
    scale = float(jnp.max(jnp.abs(ref)))
    # bf16-fed MXU vs f32 reference: loose-but-discriminating relative tolerance.
    assert err <= 5e-2 * scale + 5e-2, f"kernel/ref mismatch: err={err}, scale={scale}"

    print("KERNEL_OK")
</pallas_src>

<mosaic_0001>
module attributes {stable_mosaic.version = 11 : i64} {
  func.func @_rirb_decoder_kernel(%arg0: i32, %arg1: memref<1x4x256xf32, #tpu.memory_space<vmem>>, %arg2: memref<8x36xbf16, #tpu.memory_space<vmem>>, %arg3: memref<8x1xf32, #tpu.memory_space<vmem>>, %arg4: memref<8x1xf32, #tpu.memory_space<vmem>>, %arg5: memref<4x72xbf16, #tpu.memory_space<vmem>>, %arg6: memref<4x1xf32, #tpu.memory_space<vmem>>, %arg7: memref<4x1xf32, #tpu.memory_space<vmem>>, %arg8: memref<4x4xbf16, #tpu.memory_space<vmem>>, %arg9: memref<4x1xf32, #tpu.memory_space<vmem>>, %arg10: memref<4x1xf32, #tpu.memory_space<vmem>>, %arg11: memref<4x4xbf16, #tpu.memory_space<vmem>>, %arg12: memref<4x1xf32, #tpu.memory_space<vmem>>, %arg13: memref<4x1xf32, #tpu.memory_space<vmem>>, %arg14: memref<8x36xbf16, #tpu.memory_space<vmem>>, %arg15: memref<8x1xf32, #tpu.memory_space<vmem>>, %arg16: memref<8x1xf32, #tpu.memory_space<vmem>>, %arg17: memref<1x8x256xf32, #tpu.memory_space<vmem>>) attributes {dimension_semantics = [#tpu.dimension_semantics<parallel>], iteration_bounds = array<i64: 2>, scalar_prefetch = 0 : i64, scratch_operands = 0 : i64, tpu.core_type = #tpu.core_type<tc>, window_params = [{transform_indices = @transform_0, window_bounds = array<i64: 1, 4, 256>}, {pipeline_mode = #tpu.pipeline_mode<synchronous>, transform_indices = @transform_1, window_bounds = array<i64: 8, 36>}, {pipeline_mode = #tpu.pipeline_mode<synchronous>, transform_indices = @transform_2, window_bounds = array<i64: 8, 1>}, {pipeline_mode = #tpu.pipeline_mode<synchronous>, transform_indices = @transform_3, window_bounds = array<i64: 8, 1>}, {pipeline_mode = #tpu.pipeline_mode<synchronous>, transform_indices = @transform_4, window_bounds = array<i64: 4, 72>}, {pipeline_mode = #tpu.pipeline_mode<synchronous>, transform_indices = @transform_5, window_bounds = array<i64: 4, 1>}, {pipeline_mode = #tpu.pipeline_mode<synchronous>, transform_indices = @transform_6, window_bounds = array<i64: 4, 1>}, {pipeline_mode = #tpu.pipeline_mode<synchronous>, transform_indices = @transform_7, window_bounds = array<i64: 4, 4>}, {pipeline_mode = #tpu.pipeline_mode<synchronous>, transform_indices = @transform_8, window_bounds = array<i64: 4, 1>}, {pipeline_mode = #tpu.pipeline_mode<synchronous>, transform_indices = @transform_9, window_bounds = array<i64: 4, 1>}, {pipeline_mode = #tpu.pipeline_mode<synchronous>, transform_indices = @transform_10, window_bounds = array<i64: 4, 4>}, {pipeline_mode = #tpu.pipeline_mode<synchronous>, transform_indices = @transform_11, window_bounds = array<i64: 4, 1>}, {pipeline_mode = #tpu.pipeline_mode<synchronous>, transform_indices = @transform_12, window_bounds = array<i64: 4, 1>}, {pipeline_mode = #tpu.pipeline_mode<synchronous>, transform_indices = @transform_13, window_bounds = array<i64: 8, 36>}, {pipeline_mode = #tpu.pipeline_mode<synchronous>, transform_indices = @transform_14, window_bounds = array<i64: 8, 1>}, {pipeline_mode = #tpu.pipeline_mode<synchronous>, transform_indices = @transform_15, window_bounds = array<i64: 8, 1>}, {transform_indices = @transform_16, window_bounds = array<i64: 1, 8, 256>}]} {
    %c0 = arith.constant 0 : index
    %c0_0 = arith.constant 0 : index
    %c0_1 = arith.constant 0 : index
    %0 = vector.load %arg1[%c0, %c0_0, %c0_1] : memref<1x4x256xf32, #tpu.memory_space<vmem>>, vector<1x4x256xf32>
    %1 = vector.shape_cast %0 : vector<1x4x256xf32> to vector<4x256xf32>
    %c0_2 = arith.constant 0 : index
    %c0_3 = arith.constant 0 : index
    %2 = vector.load %arg3[%c0_2, %c0_3] : memref<8x1xf32, #tpu.memory_space<vmem>>, vector<8x1xf32>
    %c0_4 = arith.constant 0 : index
    %c0_5 = arith.constant 0 : index
    %3 = vector.load %arg4[%c0_4, %c0_5] : memref<8x1xf32, #tpu.memory_space<vmem>>, vector<8x1xf32>
    %4 = tpu.iota {dimensions = array<i32: 1>} : vector<1x256xi32>
    %c16_i32 = arith.constant 16 : i32
    %c0_i32 = arith.constant 0 : i32
    %5 = arith.cmpi eq, %c16_i32, %c0_i32 : i32
    %c1_i32 = arith.constant 1 : i32
    %6 = arith.select %5, %c1_i32, %c16_i32 : i32
    %7 = vector.broadcast %6 : i32 to vector<1x256xi32>
    %8 = arith.remsi %4, %7 : vector<1x256xi32>
    %c0_i32_6 = arith.constant 0 : i32
    %9 = vector.broadcast %c0_i32_6 : i32 to vector<1x256xi32>
    %10 = arith.cmpi ne, %8, %9 : vector<1x256xi32>
    %c0_i32_7 = arith.constant 0 : i32
    %11 = vector.broadcast %c0_i32_7 : i32 to vector<1x256xi32>
    %12 = arith.cmpi slt, %8, %11 : vector<1x256xi32>
    %c0_i32_8 = arith.constant 0 : i32
    %13 = arith.cmpi slt, %6, %c0_i32_8 : i32
    %14 = vector.broadcast %13 : i1 to vector<1x256xi1>
    %15 = vector.broadcast %14 : vector<1x256xi1> to vector<1x256xi1>
    %16 = arith.xori %12, %15 : vector<1x256xi1>
    %17 = arith.andi %16, %10 : vector<1x256xi1>
    %18 = vector.broadcast %6 : i32 to vector<1x256xi32>
    %19 = arith.addi %8, %18 : vector<1x256xi32>
    %20 = arith.select %17, %19, %8 : vector<1x256xi1>, vector<1x256xi32>
    %cst = arith.constant 0.000000e+00 : f32
    %21 = vector.broadcast %cst : f32 to vector<4x17xf32>
    %22 = vector.extract_strided_slice %1 {offsets = [0, 0], sizes = [4, 239], strides = [1, 1]} : vector<4x256xf32> to vector<4x239xf32>
    %23 = tpu.concatenate %21, %22 in 1 : vector<4x17xf32>, vector<4x239xf32> -> vector<4x256xf32>
    %c1_i32_9 = arith.constant 1 : i32
    %24 = vector.broadcast %c1_i32_9 : i32 to vector<1x256xi32>
    %25 = arith.cmpi sge, %20, %24 : vector<1x256xi32>
    %cst_10 = arith.constant 0.000000e+00 : f32
    %26 = vector.shape_cast %25 : vector<1x256xi1> to vector<1x256xi1>
    %27 = vector.broadcast %26 : vector<1x256xi1> to vector<4x256xi1>
    %28 = vector.broadcast %cst_10 : f32 to vector<4x256xf32>
    %29 = arith.select %27, %23, %28 : vector<4x256xi1>, vector<4x256xf32>
    %cst_11 = arith.constant 0.000000e+00 : f32
    %30 = vector.broadcast %cst_11 : f32 to vector<4x16xf32>
    %31 = vector.extract_strided_slice %1 {offsets = [0, 0], sizes = [4, 240], strides = [1, 1]} : vector<4x256xf32> to vector<4x240xf32>
    %32 = tpu.concatenate %30, %31 in 1 : vector<4x16xf32>, vector<4x240xf32> -> vector<4x256xf32>
    %cst_12 = arith.constant 0.000000e+00 : f32
    %33 = vector.broadcast %cst_12 : f32 to vector<4x15xf32>
    %34 = vector.extract_strided_slice %1 {offsets = [0, 0], sizes = [4, 241], strides = [1, 1]} : vector<4x256xf32> to vector<4x241xf32>
    %35 = tpu.concatenate %33, %34 in 1 : vector<4x15xf32>, vector<4x241xf32> -> vector<4x256xf32>
    %c15_i32 = arith.constant 15 : i32
    %36 = vector.broadcast %c15_i32 : i32 to vector<1x256xi32>
    %37 = arith.cmpi slt, %20, %36 : vector<1x256xi32>
    %cst_13 = arith.constant 0.000000e+00 : f32
    %38 = vector.shape_cast %37 : vector<1x256xi1> to vector<1x256xi1>
    %39 = vector.broadcast %38 : vector<1x256xi1> to vector<4x256xi1>
    %40 = vector.broadcast %cst_13 : f32 to vector<4x256xf32>
    %41 = arith.select %39, %35, %40 : vector<4x256xi1>, vector<4x256xf32>
    %cst_14 = arith.constant 0.000000e+00 : f32
    %42 = vector.broadcast %cst_14 : f32 to vector<4x1xf32>
    %43 = vector.extract_strided_slice %1 {offsets = [0, 0], sizes = [4, 255], strides = [1, 1]} : vector<4x256xf32> to vector<4x255xf32>
    %44 = tpu.concatenate %42, %43 in 1 : vector<4x1xf32>, vector<4x255xf32> -> vector<4x256xf32>
    %c1_i32_15 = arith.constant 1 : i32
    %45 = vector.broadcast %c1_i32_15 : i32 to vector<1x256xi32>
    %46 = arith.cmpi sge, %20, %45 : vector<1x256xi32>
    %cst_16 = arith.constant 0.000000e+00 : f32
    %47 = vector.shape_cast %46 : vector<1x256xi1> to vector<1x256xi1>
    %48 = vector.broadcast %47 : vector<1x256xi1> to vector<4x256xi1>
    %49 = vector.broadcast %cst_16 : f32 to vector<4x256xf32>
    %50 = arith.select %48, %44, %49 : vector<4x256xi1>, vector<4x256xf32>
    %cst_17 = arith.constant 0.000000e+00 : f32
    %51 = vector.broadcast %cst_17 : f32 to vector<4x1xf32>
    %52 = vector.extract_strided_slice %1 {offsets = [0, 1], sizes = [4, 255], strides = [1, 1]} : vector<4x256xf32> to vector<4x255xf32>
    %53 = tpu.concatenate %52, %51 in 1 : vector<4x255xf32>, vector<4x1xf32> -> vector<4x256xf32>
    %c15_i32_18 = arith.constant 15 : i32
    %54 = vector.broadcast %c15_i32_18 : i32 to vector<1x256xi32>
    %55 = arith.cmpi slt, %20, %54 : vector<1x256xi32>
    %cst_19 = arith.constant 0.000000e+00 : f32
    %56 = vector.shape_cast %55 : vector<1x256xi1> to vector<1x256xi1>
    %57 = vector.broadcast %56 : vector<1x256xi1> to vector<4x256xi1>
    %58 = vector.broadcast %cst_19 : f32 to vector<4x256xf32>
    %59 = arith.select %57, %53, %58 : vector<4x256xi1>, vector<4x256xf32>
    %cst_20 = arith.constant 0.000000e+00 : f32
    %60 = vector.broadcast %cst_20 : f32 to vector<4x15xf32>
    %61 = vector.extract_strided_slice %1 {offsets = [0, 15], sizes = [4, 241], strides = [1, 1]} : vector<4x256xf32> to vector<4x241xf32>
    %62 = tpu.concatenate %61, %60 in 1 : vector<4x241xf32>, vector<4x15xf32> -> vector<4x256xf32>
    %c1_i32_21 = arith.constant 1 : i32
    %63 = vector.broadcast %c1_i32_21 : i32 to vector<1x256xi32>
    %64 = arith.cmpi sge, %20, %63 : vector<1x256xi32>
    %cst_22 = arith.constant 0.000000e+00 : f32
    %65 = vector.shape_cast %64 : vector<1x256xi1> to vector<1x256xi1>
    %66 = vector.broadcast %65 : vector<1x256xi1> to vector<4x256xi1>
    %67 = vector.broadcast %cst_22 : f32 to vector<4x256xf32>
    %68 = arith.select %66, %62, %67 : vector<4x256xi1>, vector<4x256xf32>
    %cst_23 = arith.constant 0.000000e+00 : f32
    %69 = vector.broadcast %cst_23 : f32 to vector<4x16xf32>
    %70 = vector.extract_strided_slice %1 {offsets = [0, 16], sizes = [4, 240], strides = [1, 1]} : vector<4x256xf32> to vector<4x240xf32>
    %71 = tpu.concatenate %70, %69 in 1 : vector<4x240xf32>, vector<4x16xf32> -> vector<4x256xf32>
    %cst_24 = arith.constant 0.000000e+00 : f32
    %72 = vector.broadcast %cst_24 : f32 to vector<4x17xf32>
    %73 = vector.extract_strided_slice %1 {offsets = [0, 17], sizes = [4, 239], strides = [1, 1]} : vector<4x256xf32> to vector<4x239xf32>
    %74 = tpu.concatenate %73, %72 in 1 : vector<4x239xf32>, vector<4x17xf32> -> vector<4x256xf32>
    %c15_i32_25 = arith.constant 15 : i32
    %75 = vector.broadcast %c15_i32_25 : i32 to vector<1x256xi32>
    %76 = arith.cmpi slt, %20, %75 : vector<1x256xi32>
    %cst_26 = arith.constant 0.000000e+00 : f32
    %77 = vector.shape_cast %76 : vector<1x256xi1> to vector<1x256xi1>
    %78 = vector.broadcast %77 : vector<1x256xi1> to vector<4x256xi1>
    %79 = vector.broadcast %cst_26 : f32 to vector<4x256xf32>
    %80 = arith.select %78, %74, %79 : vector<4x256xi1>, vector<4x256xf32>
    %81 = tpu.concatenate %29, %32, %41, %50, %1, %59, %68, %71, %80 in 0 : vector<4x256xf32>, vector<4x256xf32>, vector<4x256xf32>, vector<4x256xf32>, vector<4x256xf32>, vector<4x256xf32>, vector<4x256xf32>, vector<4x256xf32>, vector<4x256xf32> -> vector<36x256xf32>
    %82 = arith.truncf %81 : vector<36x256xf32> to vector<36x256xbf16>
    %c0_27 = arith.constant 0 : index
    %c0_28 = arith.constant 0 : index
    %83 = vector.load %arg2[%c0_27, %c0_28] : memref<8x36xbf16, #tpu.memory_space<vmem>>, vector<8x36xbf16>
    %cst_29 = arith.constant dense<0.000000e+00> : vector<8x256xf32>
    %84 = tpu.matmul %83, %82, %cst_29 {dimension_numbers = #tpu.dot_dimension_numbers<[1], [0], [0], [1], [0, 0, 1, 1], [], []>} : vector<8x36xbf16>, vector<36x256xbf16>, vector<8x256xf32> -> vector<8x256xf32>
    %85 = vector.broadcast %2 : vector<8x1xf32> to vector<8x256xf32>
    %86 = arith.mulf %84, %85 : vector<8x256xf32>
    %87 = vector.broadcast %3 : vector<8x1xf32> to vector<8x256xf32>
    %88 = arith.addf %86, %87 : vector<8x256xf32>
    %cst_30 = arith.constant 0.000000e+00 : f32
    %89 = vector.broadcast %cst_30 : f32 to vector<8x256xf32>
    %90 = arith.cmpf ogt, %88, %89 : vector<8x256xf32>
    %cst_31 = arith.constant 2.000000e-01 : f32
    %91 = vector.broadcast %cst_31 : f32 to vector<8x256xf32>
    %92 = arith.mulf %91, %88 : vector<8x256xf32>
    %93 = arith.select %90, %88, %92 : vector<8x256xi1>, vector<8x256xf32>
    %c0_32 = arith.constant 0 : index
    %c0_33 = arith.constant 0 : index
    %94 = vector.load %arg6[%c0_32, %c0_33] : memref<4x1xf32, #tpu.memory_space<vmem>>, vector<4x1xf32>
    %c0_34 = arith.constant 0 : index
    %c0_35 = arith.constant 0 : index
    %95 = vector.load %arg7[%c0_34, %c0_35] : memref<4x1xf32, #tpu.memory_space<vmem>>, vector<4x1xf32>
    %96 = tpu.iota {dimensions = array<i32: 1>} : vector<1x256xi32>
    %c16_i32_36 = arith.constant 16 : i32
    %c0_i32_37 = arith.constant 0 : i32
    %97 = arith.cmpi eq, %c16_i32_36, %c0_i32_37 : i32
    %c1_i32_38 = arith.constant 1 : i32
    %98 = arith.select %97, %c1_i32_38, %c16_i32_36 : i32
    %99 = vector.broadcast %98 : i32 to vector<1x256xi32>
    %100 = arith.remsi %96, %99 : vector<1x256xi32>
    %c0_i32_39 = arith.constant 0 : i32
    %101 = vector.broadcast %c0_i32_39 : i32 to vector<1x256xi32>
    %102 = arith.cmpi ne, %100, %101 : vector<1x256xi32>
    %c0_i32_40 = arith.constant 0 : i32
    %103 = vector.broadcast %c0_i32_40 : i32 to vector<1x256xi32>
    %104 = arith.cmpi slt, %100, %103 : vector<1x256xi32>
    %c0_i32_41 = arith.constant 0 : i32
    %105 = arith.cmpi slt, %98, %c0_i32_41 : i32
    %106 = vector.broadcast %105 : i1 to vector<1x256xi1>
    %107 = vector.broadcast %106 : vector<1x256xi1> to vector<1x256xi1>
    %108 = arith.xori %104, %107 : vector<1x256xi1>
    %109 = arith.andi %108, %102 : vector<1x256xi1>
    %110 = vector.broadcast %98 : i32 to vector<1x256xi32>
    %111 = arith.addi %100, %110 : vector<1x256xi32>
    %112 = arith.select %109, %111, %100 : vector<1x256xi1>, vector<1x256xi32>
    %cst_42 = arith.constant 0.000000e+00 : f32
    %113 = vector.broadcast %cst_42 : f32 to vector<8x17xf32>
    %114 = vector.extract_strided_slice %93 {offsets = [0, 0], sizes = [8, 239], strides = [1, 1]} : vector<8x256xf32> to vector<8x239xf32>
    %115 = tpu.concatenate %113, %114 in 1 : vector<8x17xf32>, vector<8x239xf32> -> vector<8x256xf32>
    %c1_i32_43 = arith.constant 1 : i32
    %116 = vector.broadcast %c1_i32_43 : i32 to vector<1x256xi32>
    %117 = arith.cmpi sge, %112, %116 : vector<1x256xi32>
    %cst_44 = arith.constant 0.000000e+00 : f32
    %118 = vector.shape_cast %117 : vector<1x256xi1> to vector<1x256xi1>
    %119 = vector.broadcast %118 : vector<1x256xi1> to vector<8x256xi1>
    %120 = vector.broadcast %cst_44 : f32 to vector<8x256xf32>
    %121 = arith.select %119, %115, %120 : vector<8x256xi1>, vector<8x256xf32>
    %cst_45 = arith.constant 0.000000e+00 : f32
    %122 = vector.broadcast %cst_45 : f32 to vector<8x16xf32>
    %123 = vector.extract_strided_slice %93 {offsets = [0, 0], sizes = [8, 240], strides = [1, 1]} : vector<8x256xf32> to vector<8x240xf32>
    %124 = tpu.concatenate %122, %123 in 1 : vector<8x16xf32>, vector<8x240xf32> -> vector<8x256xf32>
    %cst_46 = arith.constant 0.000000e+00 : f32
    %125 = vector.broadcast %cst_46 : f32 to vector<8x15xf32>
    %126 = vector.extract_strided_slice %93 {offsets = [0, 0], sizes = [8, 241], strides = [1, 1]} : vector<8x256xf32> to vector<8x241xf32>
    %127 = tpu.concatenate %125, %126 in 1 : vector<8x15xf32>, vector<8x241xf32> -> vector<8x256xf32>
    %c15_i32_47 = arith.constant 15 : i32
    %128 = vector.broadcast %c15_i32_47 : i32 to vector<1x256xi32>
    %129 = arith.cmpi slt, %112, %128 : vector<1x256xi32>
    %cst_48 = arith.constant 0.000000e+00 : f32
    %130 = vector.shape_cast %129 : vector<1x256xi1> to vector<1x256xi1>
    %131 = vector.broadcast %130 : vector<1x256xi1> to vector<8x256xi1>
    %132 = vector.broadcast %cst_48 : f32 to vector<8x256xf32>
    %133 = arith.select %131, %127, %132 : vector<8x256xi1>, vector<8x256xf32>
    %cst_49 = arith.constant 0.000000e+00 : f32
    %134 = vector.broadcast %cst_49 : f32 to vector<8x1xf32>
    %135 = vector.extract_strided_slice %93 {offsets = [0, 0], sizes = [8, 255], strides = [1, 1]} : vector<8x256xf32> to vector<8x255xf32>
    %136 = tpu.concatenate %134, %135 in 1 : vector<8x1xf32>, vector<8x255xf32> -> vector<8x256xf32>
    %c1_i32_50 = arith.constant 1 : i32
    %137 = vector.broadcast %c1_i32_50 : i32 to vector<1x256xi32>
    %138 = arith.cmpi sge, %112, %137 : vector<1x256xi32>
    %cst_51 = arith.constant 0.000000e+00 : f32
    %139 = vector.shape_cast %138 : vector<1x256xi1> to vector<1x256xi1>
    %140 = vector.broadcast %139 : vector<1x256xi1> to vector<8x256xi1>
    %141 = vector.broadcast %cst_51 : f32 to vector<8x256xf32>
    %142 = arith.select %140, %136, %141 : vector<8x256xi1>, vector<8x256xf32>
    %cst_52 = arith.constant 0.000000e+00 : f32
    %143 = vector.broadcast %cst_52 : f32 to vector<8x1xf32>
    %144 = vector.extract_strided_slice %93 {offsets = [0, 1], sizes = [8, 255], strides = [1, 1]} : vector<8x256xf32> to vector<8x255xf32>
    %145 = tpu.concatenate %144, %143 in 1 : vector<8x255xf32>, vector<8x1xf32> -> vector<8x256xf32>
    %c15_i32_53 = arith.constant 15 : i32
    %146 = vector.broadcast %c15_i32_53 : i32 to vector<1x256xi32>
    %147 = arith.cmpi slt, %112, %146 : vector<1x256xi32>
    %cst_54 = arith.constant 0.000000e+00 : f32
    %148 = vector.shape_cast %147 : vector<1x256xi1> to vector<1x256xi1>
    %149 = vector.broadcast %148 : vector<1x256xi1> to vector<8x256xi1>
    %150 = vector.broadcast %cst_54 : f32 to vector<8x256xf32>
    %151 = arith.select %149, %145, %150 : vector<8x256xi1>, vector<8x256xf32>
    %cst_55 = arith.constant 0.000000e+00 : f32
    %152 = vector.broadcast %cst_55 : f32 to vector<8x15xf32>
    %153 = vector.extract_strided_slice %93 {offsets = [0, 15], sizes = [8, 241], strides = [1, 1]} : vector<8x256xf32> to vector<8x241xf32>
    %154 = tpu.concatenate %153, %152 in 1 : vector<8x241xf32>, vector<8x15xf32> -> vector<8x256xf32>
    %c1_i32_56 = arith.constant 1 : i32
    %155 = vector.broadcast %c1_i32_56 : i32 to vector<1x256xi32>
    %156 = arith.cmpi sge, %112, %155 : vector<1x256xi32>
    %cst_57 = arith.constant 0.000000e+00 : f32
    %157 = vector.shape_cast %156 : vector<1x256xi1> to vector<1x256xi1>
    %158 = vector.broadcast %157 : vector<1x256xi1> to vector<8x256xi1>
    %159 = vector.broadcast %cst_57 : f32 to vector<8x256xf32>
    %160 = arith.select %158, %154, %159 : vector<8x256xi1>, vector<8x256xf32>
    %cst_58 = arith.constant 0.000000e+00 : f32
    %161 = vector.broadcast %cst_58 : f32 to vector<8x16xf32>
    %162 = vector.extract_strided_slice %93 {offsets = [0, 16], sizes = [8, 240], strides = [1, 1]} : vector<8x256xf32> to vector<8x240xf32>
    %163 = tpu.concatenate %162, %161 in 1 : vector<8x240xf32>, vector<8x16xf32> -> vector<8x256xf32>
    %cst_59 = arith.constant 0.000000e+00 : f32
    %164 = vector.broadcast %cst_59 : f32 to vector<8x17xf32>
    %165 = vector.extract_strided_slice %93 {offsets = [0, 17], sizes = [8, 239], strides = [1, 1]} : vector<8x256xf32> to vector<8x239xf32>
    %166 = tpu.concatenate %165, %164 in 1 : vector<8x239xf32>, vector<8x17xf32> -> vector<8x256xf32>
    %c15_i32_60 = arith.constant 15 : i32
    %167 = vector.broadcast %c15_i32_60 : i32 to vector<1x256xi32>
    %168 = arith.cmpi slt, %112, %167 : vector<1x256xi32>
    %cst_61 = arith.constant 0.000000e+00 : f32
    %169 = vector.shape_cast %168 : vector<1x256xi1> to vector<1x256xi1>
    %170 = vector.broadcast %169 : vector<1x256xi1> to vector<8x256xi1>
    %171 = vector.broadcast %cst_61 : f32 to vector<8x256xf32>
    %172 = arith.select %170, %166, %171 : vector<8x256xi1>, vector<8x256xf32>
    %173 = tpu.concatenate %121, %124, %133, %142, %93, %151, %160, %163, %172 in 0 : vector<8x256xf32>, vector<8x256xf32>, vector<8x256xf32>, vector<8x256xf32>, vector<8x256xf32>, vector<8x256xf32>, vector<8x256xf32>, vector<8x256xf32>, vector<8x256xf32> -> vector<72x256xf32>
    %174 = arith.truncf %173 : vector<72x256xf32> to vector<72x256xbf16>
    %c0_62 = arith.constant 0 : index
    %c0_63 = arith.constant 0 : index
    %175 = vector.load %arg5[%c0_62, %c0_63] : memref<4x72xbf16, #tpu.memory_space<vmem>>, vector<4x72xbf16>
    %cst_64 = arith.constant dense<0.000000e+00> : vector<4x256xf32>
    %176 = tpu.matmul %175, %174, %cst_64 {dimension_numbers = #tpu.dot_dimension_numbers<[1], [0], [0], [1], [0, 0, 1, 1], [], []>} : vector<4x72xbf16>, vector<72x256xbf16>, vector<4x256xf32> -> vector<4x256xf32>
    %177 = vector.broadcast %94 : vector<4x1xf32> to vector<4x256xf32>
    %178 = arith.mulf %176, %177 : vector<4x256xf32>
    %179 = vector.broadcast %95 : vector<4x1xf32> to vector<4x256xf32>
    %180 = arith.addf %178, %179 : vector<4x256xf32>
    %cst_65 = arith.constant 0.000000e+00 : f32
    %181 = vector.broadcast %cst_65 : f32 to vector<4x256xf32>
    %182 = arith.cmpf ogt, %180, %181 : vector<4x256xf32>
    %cst_66 = arith.constant 2.000000e-01 : f32
    %183 = vector.broadcast %cst_66 : f32 to vector<4x256xf32>
    %184 = arith.mulf %183, %180 : vector<4x256xf32>
    %185 = arith.select %182, %180, %184 : vector<4x256xi1>, vector<4x256xf32>
    %c0_67 = arith.constant 0 : index
    %c0_68 = arith.constant 0 : index
    %186 = vector.load %arg8[%c0_67, %c0_68] : memref<4x4xbf16, #tpu.memory_space<vmem>>, vector<4x4xbf16>
    %187 = arith.truncf %185 : vector<4x256xf32> to vector<4x256xbf16>
    %cst_69 = arith.constant dense<0.000000e+00> : vector<4x256xf32>
    %188 = tpu.matmul %186, %187, %cst_69 {dimension_numbers = #tpu.dot_dimension_numbers<[1], [0], [0], [1], [0, 0, 1, 1], [], []>} : vector<4x4xbf16>, vector<4x256xbf16>, vector<4x256xf32> -> vector<4x256xf32>
    %c0_70 = arith.constant 0 : index
    %c0_71 = arith.constant 0 : index
    %189 = vector.load %arg9[%c0_70, %c0_71] : memref<4x1xf32, #tpu.memory_space<vmem>>, vector<4x1xf32>
    %190 = vector.broadcast %189 : vector<4x1xf32> to vector<4x256xf32>
    %191 = arith.mulf %188, %190 : vector<4x256xf32>
    %c0_72 = arith.constant 0 : index
    %c0_73 = arith.constant 0 : index
    %192 = vector.load %arg10[%c0_72, %c0_73] : memref<4x1xf32, #tpu.memory_space<vmem>>, vector<4x1xf32>
    %193 = vector.broadcast %192 : vector<4x1xf32> to vector<4x256xf32>
    %194 = arith.addf %191, %193 : vector<4x256xf32>
    %cst_74 = arith.constant 0.000000e+00 : f32
    %195 = vector.broadcast %cst_74 : f32 to vector<4x256xf32>
    %196 = arith.cmpf ogt, %194, %195 : vector<4x256xf32>
    %cst_75 = arith.constant 2.000000e-01 : f32
    %197 = vector.broadcast %cst_75 : f32 to vector<4x256xf32>
    %198 = arith.mulf %197, %194 : vector<4x256xf32>
    %199 = arith.select %196, %194, %198 : vector<4x256xi1>, vector<4x256xf32>
    %c0_76 = arith.constant 0 : index
    %c0_77 = arith.constant 0 : index
    %200 = vector.load %arg11[%c0_76, %c0_77] : memref<4x4xbf16, #tpu.memory_space<vmem>>, vector<4x4xbf16>
    %201 = arith.truncf %199 : vector<4x256xf32> to vector<4x256xbf16>
    %cst_78 = arith.constant dense<0.000000e+00> : vector<4x256xf32>
    %202 = tpu.matmul %200, %201, %cst_78 {dimension_numbers = #tpu.dot_dimension_numbers<[1], [0], [0], [1], [0, 0, 1, 1], [], []>} : vector<4x4xbf16>, vector<4x256xbf16>, vector<4x256xf32> -> vector<4x256xf32>
    %c0_79 = arith.constant 0 : index
    %c0_80 = arith.constant 0 : index
    %203 = vector.load %arg12[%c0_79, %c0_80] : memref<4x1xf32, #tpu.memory_space<vmem>>, vector<4x1xf32>
    %204 = vector.broadcast %203 : vector<4x1xf32> to vector<4x256xf32>
    %205 = arith.mulf %202, %204 : vector<4x256xf32>
    %c0_81 = arith.constant 0 : index
    %c0_82 = arith.constant 0 : index
    %206 = vector.load %arg13[%c0_81, %c0_82] : memref<4x1xf32, #tpu.memory_space<vmem>>, vector<4x1xf32>
    %207 = vector.broadcast %206 : vector<4x1xf32> to vector<4x256xf32>
    %208 = arith.addf %205, %207 : vector<4x256xf32>
    %cst_83 = arith.constant 0.000000e+00 : f32
    %209 = vector.broadcast %cst_83 : f32 to vector<4x256xf32>
    %210 = arith.cmpf ogt, %208, %209 : vector<4x256xf32>
    %cst_84 = arith.constant 2.000000e-01 : f32
    %211 = vector.broadcast %cst_84 : f32 to vector<4x256xf32>
    %212 = arith.mulf %211, %208 : vector<4x256xf32>
    %213 = arith.select %210, %208, %212 : vector<4x256xi1>, vector<4x256xf32>
    %214 = arith.addf %185, %213 : vector<4x256xf32>
    %c0_85 = arith.constant 0 : index
    %c0_86 = arith.constant 0 : index
    %215 = vector.load %arg15[%c0_85, %c0_86] : memref<8x1xf32, #tpu.memory_space<vmem>>, vector<8x1xf32>
    %c0_87 = arith.constant 0 : index
    %c0_88 = arith.constant 0 : index
    %216 = vector.load %arg16[%c0_87, %c0_88] : memref<8x1xf32, #tpu.memory_space<vmem>>, vector<8x1xf32>
    %217 = tpu.iota {dimensions = array<i32: 1>} : vector<1x256xi32>
    %c16_i32_89 = arith.constant 16 : i32
    %c0_i32_90 = arith.constant 0 : i32
    %218 = arith.cmpi eq, %c16_i32_89, %c0_i32_90 : i32
    %c1_i32_91 = arith.constant 1 : i32
    %219 = arith.select %218, %c1_i32_91, %c16_i32_89 : i32
    %220 = vector.broadcast %219 : i32 to vector<1x256xi32>
    %221 = arith.remsi %217, %220 : vector<1x256xi32>
    %c0_i32_92 = arith.constant 0 : i32
    %222 = vector.broadcast %c0_i32_92 : i32 to vector<1x256xi32>
    %223 = arith.cmpi ne, %221, %222 : vector<1x256xi32>
    %c0_i32_93 = arith.constant 0 : i32
    %224 = vector.broadcast %c0_i32_93 : i32 to vector<1x256xi32>
    %225 = arith.cmpi slt, %221, %224 : vector<1x256xi32>
    %c0_i32_94 = arith.constant 0 : i32
    %226 = arith.cmpi slt, %219, %c0_i32_94 : i32
    %227 = vector.broadcast %226 : i1 to vector<1x256xi1>
    %228 = vector.broadcast %227 : vector<1x256xi1> to vector<1x256xi1>
    %229 = arith.xori %225, %228 : vector<1x256xi1>
    %230 = arith.andi %229, %223 : vector<1x256xi1>
    %231 = vector.broadcast %219 : i32 to vector<1x256xi32>
    %232 = arith.addi %221, %231 : vector<1x256xi32>
    %233 = arith.select %230, %232, %221 : vector<1x256xi1>, vector<1x256xi32>
    %cst_95 = arith.constant 0.000000e+00 : f32
    %234 = vector.broadcast %cst_95 : f32 to vector<4x17xf32>
    %235 = vector.extract_strided_slice %214 {offsets = [0, 0], sizes = [4, 239], strides = [1, 1]} : vector<4x256xf32> to vector<4x239xf32>
    %236 = tpu.concatenate %234, %235 in 1 : vector<4x17xf32>, vector<4x239xf32> -> vector<4x256xf32>
    %c1_i32_96 = arith.constant 1 : i32
    %237 = vector.broadcast %c1_i32_96 : i32 to vector<1x256xi32>
    %238 = arith.cmpi sge, %233, %237 : vector<1x256xi32>
    %cst_97 = arith.constant 0.000000e+00 : f32
    %239 = vector.shape_cast %238 : vector<1x256xi1> to vector<1x256xi1>
    %240 = vector.broadcast %239 : vector<1x256xi1> to vector<4x256xi1>
    %241 = vector.broadcast %cst_97 : f32 to vector<4x256xf32>
    %242 = arith.select %240, %236, %241 : vector<4x256xi1>, vector<4x256xf32>
    %cst_98 = arith.constant 0.000000e+00 : f32
    %243 = vector.broadcast %cst_98 : f32 to vector<4x16xf32>
    %244 = vector.extract_strided_slice %214 {offsets = [0, 0], sizes = [4, 240], strides = [1, 1]} : vector<4x256xf32> to vector<4x240xf32>
    %245 = tpu.concatenate %243, %244 in 1 : vector<4x16xf32>, vector<4x240xf32> -> vector<4x256xf32>
    %cst_99 = arith.constant 0.000000e+00 : f32
    %246 = vector.broadcast %cst_99 : f32 to vector<4x15xf32>
    %247 = vector.extract_strided_slice %214 {offsets = [0, 0], sizes = [4, 241], strides = [1, 1]} : vector<4x256xf32> to vector<4x241xf32>
    %248 = tpu.concatenate %246, %247 in 1 : vector<4x15xf32>, vector<4x241xf32> -> vector<4x256xf32>
    %c15_i32_100 = arith.constant 15 : i32
    %249 = vector.broadcast %c15_i32_100 : i32 to vector<1x256xi32>
    %250 = arith.cmpi slt, %233, %249 : vector<1x256xi32>
    %cst_101 = arith.constant 0.000000e+00 : f32
    %251 = vector.shape_cast %250 : vector<1x256xi1> to vector<1x256xi1>
    %252 = vector.broadcast %251 : vector<1x256xi1> to vector<4x256xi1>
    %253 = vector.broadcast %cst_101 : f32 to vector<4x256xf32>
    %254 = arith.select %252, %248, %253 : vector<4x256xi1>, vector<4x256xf32>
    %cst_102 = arith.constant 0.000000e+00 : f32
    %255 = vector.broadcast %cst_102 : f32 to vector<4x1xf32>
    %256 = vector.extract_strided_slice %214 {offsets = [0, 0], sizes = [4, 255], strides = [1, 1]} : vector<4x256xf32> to vector<4x255xf32>
    %257 = tpu.concatenate %255, %256 in 1 : vector<4x1xf32>, vector<4x255xf32> -> vector<4x256xf32>
    %c1_i32_103 = arith.constant 1 : i32
    %258 = vector.broadcast %c1_i32_103 : i32 to vector<1x256xi32>
    %259 = arith.cmpi sge, %233, %258 : vector<1x256xi32>
    %cst_104 = arith.constant 0.000000e+00 : f32
    %260 = vector.shape_cast %259 : vector<1x256xi1> to vector<1x256xi1>
    %261 = vector.broadcast %260 : vector<1x256xi1> to vector<4x256xi1>
    %262 = vector.broadcast %cst_104 : f32 to vector<4x256xf32>
    %263 = arith.select %261, %257, %262 : vector<4x256xi1>, vector<4x256xf32>
    %cst_105 = arith.constant 0.000000e+00 : f32
    %264 = vector.broadcast %cst_105 : f32 to vector<4x1xf32>
    %265 = vector.extract_strided_slice %214 {offsets = [0, 1], sizes = [4, 255], strides = [1, 1]} : vector<4x256xf32> to vector<4x255xf32>
    %266 = tpu.concatenate %265, %264 in 1 : vector<4x255xf32>, vector<4x1xf32> -> vector<4x256xf32>
    %c15_i32_106 = arith.constant 15 : i32
    %267 = vector.broadcast %c15_i32_106 : i32 to vector<1x256xi32>
    %268 = arith.cmpi slt, %233, %267 : vector<1x256xi32>
    %cst_107 = arith.constant 0.000000e+00 : f32
    %269 = vector.shape_cast %268 : vector<1x256xi1> to vector<1x256xi1>
    %270 = vector.broadcast %269 : vector<1x256xi1> to vector<4x256xi1>
    %271 = vector.broadcast %cst_107 : f32 to vector<4x256xf32>
    %272 = arith.select %270, %266, %271 : vector<4x256xi1>, vector<4x256xf32>
    %cst_108 = arith.constant 0.000000e+00 : f32
    %273 = vector.broadcast %cst_108 : f32 to vector<4x15xf32>
    %274 = vector.extract_strided_slice %214 {offsets = [0, 15], sizes = [4, 241], strides = [1, 1]} : vector<4x256xf32> to vector<4x241xf32>
    %275 = tpu.concatenate %274, %273 in 1 : vector<4x241xf32>, vector<4x15xf32> -> vector<4x256xf32>
    %c1_i32_109 = arith.constant 1 : i32
    %276 = vector.broadcast %c1_i32_109 : i32 to vector<1x256xi32>
    %277 = arith.cmpi sge, %233, %276 : vector<1x256xi32>
    %cst_110 = arith.constant 0.000000e+00 : f32
    %278 = vector.shape_cast %277 : vector<1x256xi1> to vector<1x256xi1>
    %279 = vector.broadcast %278 : vector<1x256xi1> to vector<4x256xi1>
    %280 = vector.broadcast %cst_110 : f32 to vector<4x256xf32>
    %281 = arith.select %279, %275, %280 : vector<4x256xi1>, vector<4x256xf32>
    %cst_111 = arith.constant 0.000000e+00 : f32
    %282 = vector.broadcast %cst_111 : f32 to vector<4x16xf32>
    %283 = vector.extract_strided_slice %214 {offsets = [0, 16], sizes = [4, 240], strides = [1, 1]} : vector<4x256xf32> to vector<4x240xf32>
    %284 = tpu.concatenate %283, %282 in 1 : vector<4x240xf32>, vector<4x16xf32> -> vector<4x256xf32>
    %cst_112 = arith.constant 0.000000e+00 : f32
    %285 = vector.broadcast %cst_112 : f32 to vector<4x17xf32>
    %286 = vector.extract_strided_slice %214 {offsets = [0, 17], sizes = [4, 239], strides = [1, 1]} : vector<4x256xf32> to vector<4x239xf32>
    %287 = tpu.concatenate %286, %285 in 1 : vector<4x239xf32>, vector<4x17xf32> -> vector<4x256xf32>
    %c15_i32_113 = arith.constant 15 : i32
    %288 = vector.broadcast %c15_i32_113 : i32 to vector<1x256xi32>
    %289 = arith.cmpi slt, %233, %288 : vector<1x256xi32>
    %cst_114 = arith.constant 0.000000e+00 : f32
    %290 = vector.shape_cast %289 : vector<1x256xi1> to vector<1x256xi1>
    %291 = vector.broadcast %290 : vector<1x256xi1> to vector<4x256xi1>
    %292 = vector.broadcast %cst_114 : f32 to vector<4x256xf32>
    %293 = arith.select %291, %287, %292 : vector<4x256xi1>, vector<4x256xf32>
    %294 = tpu.concatenate %242, %245, %254, %263, %214, %272, %281, %284, %293 in 0 : vector<4x256xf32>, vector<4x256xf32>, vector<4x256xf32>, vector<4x256xf32>, vector<4x256xf32>, vector<4x256xf32>, vector<4x256xf32>, vector<4x256xf32>, vector<4x256xf32> -> vector<36x256xf32>
    %295 = arith.truncf %294 : vector<36x256xf32> to vector<36x256xbf16>
    %c0_115 = arith.constant 0 : index
    %c0_116 = arith.constant 0 : index
    %296 = vector.load %arg14[%c0_115, %c0_116] : memref<8x36xbf16, #tpu.memory_space<vmem>>, vector<8x36xbf16>
    %cst_117 = arith.constant dense<0.000000e+00> : vector<8x256xf32>
    %297 = tpu.matmul %296, %295, %cst_117 {dimension_numbers = #tpu.dot_dimension_numbers<[1], [0], [0], [1], [0, 0, 1, 1], [], []>} : vector<8x36xbf16>, vector<36x256xbf16>, vector<8x256xf32> -> vector<8x256xf32>
    %298 = vector.broadcast %215 : vector<8x1xf32> to vector<8x256xf32>
    %299 = arith.mulf %297, %298 : vector<8x256xf32>
    %300 = vector.broadcast %216 : vector<8x1xf32> to vector<8x256xf32>
    %301 = arith.addf %299, %300 : vector<8x256xf32>
    %cst_118 = arith.constant 0.000000e+00 : f32
    %302 = vector.broadcast %cst_118 : f32 to vector<8x256xf32>
    %303 = arith.cmpf ogt, %301, %302 : vector<8x256xf32>
    %cst_119 = arith.constant 2.000000e-01 : f32
    %304 = vector.broadcast %cst_119 : f32 to vector<8x256xf32>
    %305 = arith.mulf %304, %301 : vector<8x256xf32>
    %306 = arith.select %303, %301, %305 : vector<8x256xi1>, vector<8x256xf32>
    %307 = arith.addf %93, %306 : vector<8x256xf32>
    %c0_120 = arith.constant 0 : index
    %c0_121 = arith.constant 0 : index
    %c0_122 = arith.constant 0 : index
    %308 = vector.load %arg17[%c0_120, %c0_121, %c0_122] : memref<1x8x256xf32, #tpu.memory_space<vmem>>, vector<1x8x256xf32>
    %309 = vector.shape_cast %308 : vector<1x8x256xf32> to vector<8x256xf32>
    %310 = vector.shape_cast %307 : vector<8x256xf32> to vector<1x8x256xf32>
    tpu.vector_store %arg17[%c0_120, %c0_121, %c0_122], %310 {strides = array<i32>} : memref<1x8x256xf32, #tpu.memory_space<vmem>>, vector<1x8x256xf32>,
    return
  }
  func.func @transform_0(%arg0: i32) -> (i32, i32, i32) {
    %c0_i32 = arith.constant 0 : i32
    %c0_i32_0 = arith.constant 0 : i32
    %c0_i32_1 = arith.constant 0 : i32
    return %arg0, %c0_i32, %c0_i32_0 : i32, i32, i32
  }
  func.func @transform_1(%arg0: i32) -> (i32, i32) {
    %c0_i32 = arith.constant 0 : i32
    %c0_i32_0 = arith.constant 0 : i32
    %c0_i32_1 = arith.constant 0 : i32
    return %c0_i32, %c0_i32_0 : i32, i32
  }
  func.func @transform_2(%arg0: i32) -> (i32, i32) {
    %c0_i32 = arith.constant 0 : i32
    %c0_i32_0 = arith.constant 0 : i32
    %c0_i32_1 = arith.constant 0 : i32
    return %c0_i32, %c0_i32_0 : i32, i32
  }
  func.func @transform_3(%arg0: i32) -> (i32, i32) {
    %c0_i32 = arith.constant 0 : i32
    %c0_i32_0 = arith.constant 0 : i32
    %c0_i32_1 = arith.constant 0 : i32
    return %c0_i32, %c0_i32_0 : i32, i32
  }
  func.func @transform_4(%arg0: i32) -> (i32, i32) {
    %c0_i32 = arith.constant 0 : i32
    %c0_i32_0 = arith.constant 0 : i32
    %c0_i32_1 = arith.constant 0 : i32
    return %c0_i32, %c0_i32_0 : i32, i32
  }
  func.func @transform_5(%arg0: i32) -> (i32, i32) {
    %c0_i32 = arith.constant 0 : i32
    %c0_i32_0 = arith.constant 0 : i32
    %c0_i32_1 = arith.constant 0 : i32
    return %c0_i32, %c0_i32_0 : i32, i32
  }
  func.func @transform_6(%arg0: i32) -> (i32, i32) {
    %c0_i32 = arith.constant 0 : i32
    %c0_i32_0 = arith.constant 0 : i32
    %c0_i32_1 = arith.constant 0 : i32
    return %c0_i32, %c0_i32_0 : i32, i32
  }
  func.func @transform_7(%arg0: i32) -> (i32, i32) {
    %c0_i32 = arith.constant 0 : i32
    %c0_i32_0 = arith.constant 0 : i32
    %c0_i32_1 = arith.constant 0 : i32
    return %c0_i32, %c0_i32_0 : i32, i32
  }
  func.func @transform_8(%arg0: i32) -> (i32, i32) {
    %c0_i32 = arith.constant 0 : i32
    %c0_i32_0 = arith.constant 0 : i32
    %c0_i32_1 = arith.constant 0 : i32
    return %c0_i32, %c0_i32_0 : i32, i32
  }
  func.func @transform_9(%arg0: i32) -> (i32, i32) {
    %c0_i32 = arith.constant 0 : i32
    %c0_i32_0 = arith.constant 0 : i32
    %c0_i32_1 = arith.constant 0 : i32
    return %c0_i32, %c0_i32_0 : i32, i32
  }
  func.func @transform_10(%arg0: i32) -> (i32, i32) {
    %c0_i32 = arith.constant 0 : i32
    %c0_i32_0 = arith.constant 0 : i32
    %c0_i32_1 = arith.constant 0 : i32
    return %c0_i32, %c0_i32_0 : i32, i32
  }
  func.func @transform_11(%arg0: i32) -> (i32, i32) {
    %c0_i32 = arith.constant 0 : i32
    %c0_i32_0 = arith.constant 0 : i32
    %c0_i32_1 = arith.constant 0 : i32
    return %c0_i32, %c0_i32_0 : i32, i32
  }
  func.func @transform_12(%arg0: i32) -> (i32, i32) {
    %c0_i32 = arith.constant 0 : i32
    %c0_i32_0 = arith.constant 0 : i32
    %c0_i32_1 = arith.constant 0 : i32
    return %c0_i32, %c0_i32_0 : i32, i32
  }
  func.func @transform_13(%arg0: i32) -> (i32, i32) {
    %c0_i32 = arith.constant 0 : i32
    %c0_i32_0 = arith.constant 0 : i32
    %c0_i32_1 = arith.constant 0 : i32
    return %c0_i32, %c0_i32_0 : i32, i32
  }
  func.func @transform_14(%arg0: i32) -> (i32, i32) {
    %c0_i32 = arith.constant 0 : i32
    %c0_i32_0 = arith.constant 0 : i32
    %c0_i32_1 = arith.constant 0 : i32
    return %c0_i32, %c0_i32_0 : i32, i32
  }
  func.func @transform_15(%arg0: i32) -> (i32, i32) {
    %c0_i32 = arith.constant 0 : i32
    %c0_i32_0 = arith.constant 0 : i32
    %c0_i32_1 = arith.constant 0 : i32
    return %c0_i32, %c0_i32_0 : i32, i32
  }
  func.func @transform_16(%arg0: i32) -> (i32, i32, i32) {
    %c0_i32 = arith.constant 0 : i32
    %c0_i32_0 = arith.constant 0 : i32
    %c0_i32_1 = arith.constant 0 : i32
    return %arg0, %c0_i32, %c0_i32_0 : i32, i32, i32
  }
}

</mosaic_0001>

<bundles_post_ra>
// kernel: tpu_custom_call.1
= control target key start
LH: loop header
LB: loop body
LE: loop exit
PB: predicated region body
PF: predicated region fallthrough
CT: control target
= control target key end

     0   :  { %s2103_s0 = inlined_call_operand.vmem [shape: f32[2,4,256], index: 0, kind: input, shape index: {}]   ;;  %s2104_s1 = inlined_call_operand.vmem [shape: bf16[8,36], index: 1, kind: input, shape index: {}]   ;;  %s2105_s2 = inlined_call_operand.vmem [shape: f32[8,1], index: 2, kind: input, shape index: {}]   ;;  %s2106_s3 = inlined_call_operand.vmem [shape: f32[8,1], index: 3, kind: input, shape index: {}]   ;;  %s2107_s4 = inlined_call_operand.vmem [shape: bf16[4,72], index: 4, kind: input, shape index: {}]   ;;  %s2108_s5 = inlined_call_operand.vmem [shape: f32[4,1], index: 5, kind: input, shape index: {}]   ;;  %s2109_s6 = inlined_call_operand.vmem [shape: f32[4,1], index: 6, kind: input, shape index: {}]   ;;  %s2110_s7 = inlined_call_operand.vmem [shape: bf16[4,4], index: 7, kind: input, shape index: {}]   ;;  %s2111_s8 = inlined_call_operand.vmem [shape: f32[4,1], index: 8, kind: input, shape index: {}]   ;;  %s2112_s9 = inlined_call_operand.vmem [shape: f32[4,1], index: 9, kind: input, shape index: {}]   ;;  %s2113_s10 = inlined_call_operand.vmem [shape: bf16[4,4], index: 10, kind: input, shape index: {}]   ;;  %s2114_s11 = inlined_call_operand.vmem [shape: f32[4,1], index: 11, kind: input, shape index: {}]   ;;  %s2115_s12 = inlined_call_operand.vmem [shape: f32[4,1], index: 12, kind: input, shape index: {}]   ;;  %s2116_s13 = inlined_call_operand.vmem [shape: bf16[8,36], index: 13, kind: input, shape index: {}]   ;;  %s2117_s14 = inlined_call_operand.vmem [shape: f32[8,1], index: 14, kind: input, shape index: {}]   ;;  %s2118_s15 = inlined_call_operand.vmem [shape: f32[8,1], index: 15, kind: input, shape index: {}]   ;;  %s2119_s16 = inlined_call_operand.hbm [shape: f32[2,8,256], index: 16, kind: output, shape index: {}]  }
   0x1   :  { %2142 = sst [smem:[#allocation10_spill]] %s2103_s0 }
   0x2   :  { %2143 = sst [smem:[#allocation11_spill]] %s2104_s1 }
   0x3   :  { %2144 = sst [smem:[#allocation12_spill]] %s2105_s2 }
   0x4   :  { %2145 = sst [smem:[#allocation13_spill]] %s2106_s3 }
   0x5   :  { %21 = vsyncpa [#allocation3], 0 }
   0x6   :  { %23 = vsyncpa [#allocation3 + $0x1], 0  ;;  %s1717_s21 = smov 0   ;;  %s1719_s22 = smov 0  }
   0x7   :  { %s1721_s23 = smov 0   ;;  %s1723_s24 = smov 0  }
   0x8 LB: > { %2146 = sst [smem:[#allocation5_spill]] %s1607_s21  ;;  %s1738_s25 = sadd.s32 4294967295, %s1619_s24   ;;  %s1619_s24 = sphi %s1723_s24, %s2197_s24   ;;  %s1615_s23 = sphi %s1721_s23, %s2199_s23   ;;  %s1611_s22 = sphi %s1719_s22, %s2201_s22   ;;  %s1607_s21 = sphi %s1717_s21, %s2200_s21  }
   0x9   : > { %2147 = sst [smem:[#allocation6_spill]] %s1615_s23  ;;  %s1336_s26 = sadd.s32 4294967294, %s1619_s24  }
   0xa   : > { %s1742_s27 = sadd.s32 1, %s1619_s24   ;;  %s377_s28 = sadd.s32 1, %s1615_s23 }
   0xb   : > { %2148 = sst [smem:[#allocation7_spill]] %s1742_s27  ;;  %s374_s29 = ssub.s32 %s1619_s24, %s1742_s27 }
   0xc   : > { %p387_p0 = scmp.ne.s32.totalorder %s1615_s23, %s1611_s22  ;;  %p375_p1 = scmp.eq.s32.totalorder %s374_s29, 0 }
   0xd   : > { %p388_p2 = scmp.eq.s32.totalorder %s1738_s25, 1  ;;  %p393_p3 = scmp.ne.s32.totalorder %s1611_s22, %s1607_s21 }
   0xe   : > { %p394_p4 = scmp.eq.s32.totalorder %s1336_s26, 1  ;;  %p1339_p7 = scmp.ge.s32.totalorder %s1619_s24, 1 }
   0xf   : > { %s1753_s30 = scalar_select %p375_p1, %s1615_s23, %s377_s28  }
  0x10   : > { %p1755_p5 = por %p388_p2, %p387_p0  ;;  %p1759_p6 = por %p394_p4, %p393_p3 }
  0x11   : > { %2149 = sst [smem:[#allocation8_spill]] %s1753_s30  ;;  %p465_p8 = scmp.lt.s32.totalorder %s1619_s24, 3 }
  0x12   : > { %s2151_s17 = scalar_select %p1759_p6, 1, 0 }
  0x13   : > { %p466_p9 = pnand %p1339_p7, %p465_p8 }
  0x14   : > { %2152 = sst [smem:[#allocation9_spill]] %s2151_s17  ;;  %p515_p10 = scmp.lt.s32.totalorder (!%p466_p9), %s1738_s25, 1  ;;  %v1629_v4 = vmov (!%p466_p9), 0   ;;  %v524_v7 = vlaneseq (!%p466_p9)  ;;  %vm2140_vm0 = vcmask (!%p466_p9), 138240   ;;  %vm599_vm2 = vcmask (!%p466_p9), 7168  }
  0x15   : > { %469 = sbr.rel (%p466_p9) target bundleno = 1597 (0x63d), region = 84  ;;  %s2153_s28 = sld [smem:[#allocation10_spill]] (!%p466_p9)  ;;  %729 = vmatprep.mubr.bf16.mxu0 (!%p466_p9), %v1629_v4  ;;  %1474 = vset.pattern.permute.xlu0 (!%p466_p9), %v1629_v4  ;;  %vm582_vm4 = vcmask (!%p466_p9), 121856   ;;  %vm574_vm5 = vcmask (!%p466_p9), 130048   ;;  %vm610_vm7 = vcmask (!%p466_p9), 1039360   ;;  %vm2139_vm8 = vcmask (!%p466_p9), 1043456  }
  0x16   : > { %s2130_s30 = smov (!%p466_p9), 17   ;;  %s2127_s23 = smov (!%p466_p9), 1   ;;  %1475 = vset.pattern.permute.xlu1 (!%p466_p9), %v1629_v4  ;;  %891 = vmatprep.mubr.bf16.mxu1 (!%p466_p9), %v1629_v4  ;;  %v525_v8 = vand.u32 (!%p466_p9), 127, %v524_v7  ;;  %vm632_vm10 = vcmask (!%p466_p9), 916480   ;;  %vm2141_vm11 = vcmask (!%p466_p9), 924672   ;;  %vm640_vm12 = vcmask (!%p466_p9), 908288  }
  0x17   : > { %s2131_s20 = smov (!%p466_p9), 16   ;;  %s2125_s26 = smov (!%p466_p9), 112   ;;  %vm2129_vm13 = vcmask (!%p466_p9), 1041408   ;;  %vm2138_vm14 = vcmask (!%p466_p9), 293888  }
  0x18   : > { %s2154_s2 = sld [smem:[#allocation12_spill]] (!%p466_p9)  ;;  %s2155_s3 = sld [smem:[#allocation13_spill]] (!%p466_p9)  ;;  %v526_v9 = vadd.s32 (!%p466_p9), 128, %v525_v8  ;;  %v531_v10 = vand.u32 (!%p466_p9), 15, %v525_v8 }
  0x19   : > { %s2164_s1 = sld [smem:[#allocation11_spill]] (!%p466_p9)  ;;  %s1384_s17 = sshll.u32 (!%p466_p9), %s1738_s25, 8 }
  0x1a   : > { %v538_v11 = vand.u32 (!%p466_p9), 15, %v526_v9  ;;  %vm1798_vm1 = vcmp.ge.s32.totalorder (!%p466_p9), %v531_v10, 1  ;;  %vm1806_vm6 = vcmp.lt.s32.totalorder (!%p466_p9), %v531_v10, 15  ;;  %s1631_s21 = smov (!%p466_p9), [#allocation2]  }
  0x1c   : > { %s516_s18 = scalar_select %p515_p10, %s1738_s25, 1  ;;  %vm1802_vm3 = vcmp.ge.s32.totalorder %v538_v11, 1  ;;  %vm1815_vm9 = vcmp.lt.s32.totalorder %v538_v11, 15 }
  0x1e   : > { %s1383_s19 = sshll.u32 %s516_s18, 3  ;;  %s2121_s18 = smov 15   ;;  %v522_v5 = vld [vmem:[%s2154_s2] sm:$0xff] }
  0x1f   : > { %s519_s29 = scalar_lea.vmem %s2153_s28, %s1383_s19  ;;  %s2123_s19 = smov 127   ;;  %v523_v6 = vld [vmem:[%s2155_s3] sm:$0xff] }
  0x20   : > { %v1770_v0 = vld [vmem:[%s519_s29] sm:$0xff]  ;;  %s2134_s28 = smov 113   ;;  %s2136_s29 = smov 111  }
  0x21   : > { %v1774_v1 = vcombine.high %v1770_v0, %v1770_v0  ;;  %s2179_s2 = smov 113  }
  0x23   : > { %v1444_v2 = vpack.i.bf16 %v1774_v1, %v1770_v0  ;;  %v1454_v3 = vpack.i.bf16 %v1770_v0, %v1774_v1 }
  0x25   : > { %1445 = vrot.lane.b32.xlu1 %v1444_v2, %s2130_s30  ;;  %1435 = vrot.lane.b32.xlu0 %v1444_v2, %s2127_s23  ;;  %s2167_s23 = smov 127  }
  0x29   : > { %1450 = vrot.lane.b32.xlu1 %v1444_v2, %s2121_s18  ;;  %1440 = vrot.lane.b32.xlu0 %v1444_v2, %s2131_s20  ;;  %s2168_s18 = smov 112  }
  0x2d   : > { %1455 = vrot.lane.b32.xlu0 %v1454_v3, %s2123_s19  ;;  %1460 = vrot.lane.b32.xlu1 %v1454_v3, %s2125_s26  ;;  %s2165_s19 = smov 1   ;;  %s2166_s26 = smov 15  }
  0x31   : > { %1465 = vrot.lane.b32.xlu0 %v1454_v3, %s2134_s28  ;;  %1470 = vrot.lane.b32.xlu1 %v1444_v2, %s2136_s29 }
  0x35   : > { %740 = vperm.xlu0 %1474, %v522_v5   ;;  %747 = vperm.xlu1 %1475, %v523_v6  }
  0x97   : > { %v1446_v12 = vpop.permute.xlu1 %1445  ;;  %v1436_v14 = vpop.permute.xlu0 %1435 }
  0x98   : > { %v1448_v16 = vunpack.i.h.bf16 %v1446_v12  ;;  %v1447_v17 = vunpack.i.l.bf16 %v1446_v12  ;;  %v1438_v18 = vunpack.i.h.bf16 %v1436_v14  ;;  %v1437_v19 = vunpack.i.l.bf16 %v1436_v14 }
  0x9a   : > { %v600_v21 = vsel %vm599_vm2, %v1437_v19, %v1438_v18  ;;  %v603_v22 = vsel %vm599_vm2, 0.0, %v1437_v19  ;;  %v558_v23 = vsel %vm2140_vm0, %v1447_v17, %v1448_v16  ;;  %v561_v32 = vsel %vm2140_vm0, 0.0, %v1447_v17 }
  0x9b   : > { %v604_v24 = vsel %vm1798_vm1, %v603_v22, 0.0  ;;  %v1451_v25 = vpop.permute.xlu1 %1450  ;;  %v1441_v26 = vpop.permute.xlu0 %1440  ;;  %v605_v28 = vsel %vm1802_vm3, %v600_v21, 0.0  ;;  %v569_v34 = vsel %vm1802_vm3, %v558_v23, 0.0  ;;  %v568_v52 = vsel %vm1798_vm1, %v561_v32, 0.0  ;;  %v685_v32 = vld [vmem:[%s2164_s1] sm:$0xf] }
  0x9c   : > { %v1453_v29 = vunpack.i.h.bf16 %v1451_v25  ;;  %v1452_v30 = vunpack.i.l.bf16 %v1451_v25  ;;  %v1443_v31 = vunpack.i.h.bf16 %v1441_v26  ;;  %v1442_v33 = vunpack.i.l.bf16 %v1441_v26  ;;  %s2178_s1 = smov 111  }
  0x9d   : > { %v654_v35 = vrot.slane %v604_v24, 4  ;;  %v655_v38 = vrot.slane %v605_v28, 4 }
  0x9e   : > { %v586_v36 = vsel %vm582_vm4, 0.0, %v1452_v30  ;;  %v583_v37 = vsel %vm582_vm4, %v1452_v30, %v1453_v29  ;;  %v577_v39 = vsel %vm574_vm5, 0.0, %v1442_v33  ;;  %v575_v42 = vsel %vm574_vm5, %v1442_v33, %v1443_v31 }
  0x9f   : > { %v1456_v40 = vpop.permute.xlu0 %1455  ;;  %v1461_v41 = vpop.permute.xlu1 %1460  ;;  %v594_v43 = vsel %vm1815_vm9, %v583_v37, 0.0  ;;  %v593_v44 = vsel %vm1806_vm6, %v586_v36, 0.0  ;;  %v648_v45 = vrot.slane %v577_v39, 4  ;;  %v649_v50 = vrot.slane %v575_v42, 4 }
  0xa0   : > { %v1458_v46 = vunpack.i.h.bf16 %v1456_v40  ;;  %v1457_v47 = vunpack.i.l.bf16 %v1456_v40  ;;  %v1463_v48 = vunpack.i.h.bf16 %v1461_v41  ;;  %v1462_v49 = vunpack.i.l.bf16 %v1461_v41 }
  0xa1   : > { %v674_v51 = vsel %vm2139_vm8, %v594_v43, %v655_v38  ;;  %v671_v55 = vsel %vm2139_vm8, %v568_v52, %v648_v45  ;;  %v673_v56 = vsel %vm2139_vm8, %v593_v44, %v654_v35  ;;  %v672_v8 = vsel %vm2139_vm8, %v569_v34, %v649_v50  ;;  %v758_v50 = vld [vmem:[%s2108_s5] sm:$0xf] }
  0xa2   : > { %v611_v53 = vsel %vm610_vm7, %v1458_v46, %v1457_v47  ;;  %v614_v54 = vsel %vm610_vm7, %v1457_v47, 0.0  ;;  %v633_v59 = vsel %vm632_vm10, %v1463_v48, %v1462_v49  ;;  %v635_v60 = vsel %vm632_vm10, %v1462_v49, 0.0  ;;  %v759_v49 = vld [vmem:[%s2109_s6] sm:$0xf] }
  0xa3   : > { %v615_v57 = vsel %vm1806_vm6, %v611_v53, 0.0  ;;  %v616_v58 = vsel %vm1815_vm9, %v614_v54, 0.0  ;;  %v1466_v61 = vpop.permute.xlu0 %1465  ;;  %v1471_v62 = vpop.permute.xlu1 %1470  ;;  %v666_v3 = vrot.slane %v633_v59, 4  ;;  %v667_v5 = vrot.slane %v635_v60, 4  ;;  %v974_v52 = vld [vmem:[%s2111_s8] sm:$0xf] }
  0xa4   : > { %v661_v63 = vrot.slane %v615_v57, 4  ;;  %v662_v2 = vrot.slane %v616_v58, 4  ;;  %v1468_v6 = vunpack.i.h.bf16 %v1466_v61  ;;  %v1467_v7 = vunpack.i.l.bf16 %v1466_v61  ;;  %v1057_v53 = vld [vmem:[%s2115_s12] sm:$0xf] }
  0xa5   : > { %v679_v9 = vpack.c.bf16 %v673_v56, %v671_v55  ;;  %v680_v10 = vpack.c.bf16 %v674_v51, %v672_v8  ;;  %v1473_v11 = vunpack.i.h.bf16 %v1471_v62  ;;  %v1472_v12 = vunpack.i.l.bf16 %v1471_v62  ;;  %v982_v51 = vld [vmem:[%s2112_s9] sm:$0xf] }
  0xa6   : > { %v622_v14 = vsel %vm2141_vm11, %v1468_v6, %v1467_v7  ;;  %v625_v16 = vsel %vm2141_vm11, %v1467_v7, 0.0  ;;  %v676_v17 = vsel %vm2139_vm8, %v1774_v1, %v662_v2  ;;  %v675_v18 = vsel %vm2139_vm8, %v1770_v0, %v661_v63  ;;  %v1049_v54 = vld [vmem:[%s2114_s11] sm:$0xf] }
  0xa7   : > { %v627_v19 = vsel %vm1802_vm3, %v625_v16, 0.0  ;;  %697 = vmatprep.subr.bf16.mxu0 %v680_v10  ;;  %v644_v21 = vsel %vm640_vm12, %v1473_v11, 0.0  ;;  %v626_v22 = vsel %vm1798_vm1, %v622_v14, 0.0  ;;  %v641_v23 = vsel %vm640_vm12, %v1472_v12, %v1473_v11 }
  0xa8   : > { %698 = vmatpush1.bf16.msra.mxu0 %v679_v9  ;;  %v646_v24 = vsel %vm1815_vm9, %v644_v21, 0.0  ;;  %v678_v1 = vsel %vm2139_vm8, %v627_v19, %v667_v5  ;;  %v677_v25 = vsel %vm2139_vm8, %v626_v22, %v666_v3  ;;  %v645_v0 = vsel %vm1806_vm6, %v641_v23, 0.0 }
  0xa9   : > { %v684_v26 = vpack.c.bf16 %v646_v24, %v646_v24  ;;  %v682_v28 = vpack.c.bf16 %v678_v1, %v676_v17  ;;  %v681_v29 = vpack.c.bf16 %v677_v25, %v675_v18  ;;  %v683_v30 = vpack.c.bf16 %v645_v0, %v645_v0 }
  0xab   : > { %699 = vmatprep.subr.bf16.mxu0 %v682_v28  ;;  %v692_v31 = vsel %vm2129_vm13, %v683_v30, 0 }
  0xac   : > { %700 = vmatpush1.bf16.msra.mxu0 %v681_v29 }
  0xad   : > { %1343 = vmatprep.subr.msk.bf16.mxu0 %vm2129_vm13, %v684_v26 }
  0xb0   : > { %702 = vmatpush1.bf16.msra.mxu0 %v692_v31 }
  0xb3   : > { %1344 = vmatmul.mubr.msk.bf16.vlgmr.msra.gmra.mrb[0].mxu0 %vm2138_vm14, %v685_v32 }
  0xb4   : > { %965 = vmatprep.mubr.bf16.mxu0 %v1629_v4  ;;  %v741_v33 = vpop.permute.xlu0 %740  ;;  %v748_v35 = vpop.permute.xlu1 %747 }
 0x186   : > { %v731_v34 = vpop.f32.mrb[0].mxu0 }
 0x187   : > { %v743_v36 = vmul.f32 %v741_v33, %v731_v34  ;;  %v733_v37 = vpop.f32.mrb[1].mxu0 }
 0x188   : > { %v744_v38 = vmul.f32 %v741_v33, %v733_v37  ;;  %v735_v39 = vpop.f32.mrb[2].mxu0 }
 0x189   : > { %v750_v40 = vadd.f32 %v748_v35, %v743_v36  ;;  %v736_v41 = vpop.f32.mrb[3].mxu0 }
 0x18a   : > { %v751_v42 = vadd.f32 %v748_v35, %v744_v38 }
 0x18b   : > { %vm752_vm15 = vcmp.gt.f32.partialorder %v750_v40, 0.0  ;;  %v754_v43 = vmul.f32 0.2, %v750_v40 }
 0x18c   : > { %vm753_vm13 = vcmp.gt.f32.partialorder %v751_v42, 0.0  ;;  %v755_v44 = vmul.f32 0.2, %v751_v42 }
 0x18d   : > { %v1871_v45 = vsel %vm752_vm15, %v750_v40, %v754_v43  ;;  %vm1630_vm15 = vmmov 1  }
 0x18e   : > { %v1873_v46 = vsel %vm753_vm13, %v751_v42, %v755_v44  ;;  %vm1906_vm13 = vmneg %vm574_vm5 }
 0x18f   : > { %v1481_v47 = vpack.i.bf16 %v1873_v46, %v1871_v45  ;;  %v1501_v48 = vpack.i.bf16 %v1871_v45, %v1873_v46  ;;  %vm1345_vm14 = vmpackc.low %vm1630_vm15, %vm1802_vm3 }
 0x190   : > { %vm1349_vm8 = vmpackc.low %vm1906_vm13, %vm1798_vm1 }
 0x191   : > { %1482 = vrot.lane.b32.xlu0 %v1481_v47, %s2131_s20  ;;  %1477 = vrot.lane.b32.xlu1 %v1481_v47, %s2130_s30  ;;  %vm1352_vm13 = vmpackc.low %vm1802_vm3, %vm1815_vm9 }
 0x195   : > { %1492 = vrot.lane.b32.xlu0 %v1481_v47, %s2165_s19  ;;  %1487 = vrot.lane.b32.xlu1 %v1481_v47, %s2166_s26 }
 0x199   : > { %1502 = vrot.lane.b32.xlu0 %v1501_v48, %s2134_s28  ;;  %1497 = vrot.lane.b32.xlu1 %v1501_v48, %s2167_s23  ;;  %s2176_s28 = smov 16  }
 0x19d   : > { %1512 = vrot.lane.b32.xlu0 %v1481_v47, %s2136_s29  ;;  %1507 = vrot.lane.b32.xlu1 %v1481_v47, %s2168_s18  ;;  %s2177_s29 = smov 17  }
 0x1a1   : > { %909 = vperm.xlu0 %1474, %v759_v49   ;;  %902 = vperm.xlu1 %1475, %v758_v50   ;;  %v848_v50 = vld [vmem:[%s2107_s4] sm:$0x3] }
 0x1a5   : > { %985 = vperm.xlu0 %1474, %v982_v51   ;;  %977 = vperm.xlu1 %1475, %v974_v52  }
 0x1a9   : > { %1060 = vperm.xlu0 %1474, %v1057_v53   ;;  %1052 = vperm.xlu1 %1475, %v1049_v54  }
 0x203   : > { %v1483_v55 = vpop.permute.xlu0 %1482  ;;  %v1478_v56 = vpop.permute.xlu1 %1477 }
 0x204   : > { %v1485_v57 = vunpack.i.h.bf16 %v1483_v55  ;;  %v1484_v58 = vunpack.i.l.bf16 %v1483_v55  ;;  %v1480_v59 = vunpack.i.h.bf16 %v1478_v56  ;;  %v1479_v60 = vunpack.i.l.bf16 %v1478_v56 }
 0x206   : > { %v769_v62 = vsel %vm2140_vm0, 0.0, %v1479_v60  ;;  %v766_v63 = vsel %vm2140_vm0, %v1479_v60, %v1480_v59  ;;  %v776_v2 = vsel %vm574_vm5, %v1484_v58, %v1485_v57  ;;  %vm1361_vm0 = vmpackc.low %vm1806_vm6, %vm1630_vm15 }
 0x207   : > { %v1493_v3 = vpop.permute.xlu0 %1492  ;;  %v1488_v5 = vpop.permute.xlu1 %1487  ;;  %v1346_v6 = vpack.c.bf16 %v776_v2, %v766_v63  ;;  %v1350_v7 = vpack.c.bf16 %v1484_v58, %v769_v62 }
 0x208   : > { %v1495_v8 = vunpack.i.h.bf16 %v1493_v3  ;;  %v1494_v9 = vunpack.i.l.bf16 %v1493_v3  ;;  %v1490_v10 = vunpack.i.h.bf16 %v1488_v5  ;;  %v1489_v11 = vunpack.i.l.bf16 %v1488_v5 }
 0x209   : > { %1347 = vmatprep.subr.msk.bf16.mxu1 %vm1345_vm14, %v1346_v6  ;;  %vm1355_vm14 = vmpackc.low %vm1798_vm1, %vm1806_vm6 }
 0x20a   : > { %v794_v12 = vsel %vm599_vm2, %v1494_v9, %v1495_v8  ;;  %v797_v14 = vsel %vm599_vm2, 0.0, %v1494_v9  ;;  %v784_v16 = vsel %vm582_vm4, %v1489_v11, %v1490_v10  ;;  %v787_v17 = vsel %vm582_vm4, 0.0, %v1489_v11  ;;  %1351 = vmatpush1.bf16.msk.msra.mxu1 %vm1349_vm8, %v1350_v7  ;;  %vm1358_vm8 = vmpackc.low %vm1815_vm9, %vm1630_vm15  ;;  %v920_v7 = vld [vmem:[%s2110_s7] sm:$0x3] }
 0x20b   : > { %v1353_v18 = vpack.c.bf16 %v794_v12, %v784_v16  ;;  %v1356_v19 = vpack.c.bf16 %v797_v14, %v787_v17  ;;  %v1503_v21 = vpop.permute.xlu0 %1502  ;;  %v1498_v22 = vpop.permute.xlu1 %1497 }
 0x20c   : > { %v1500_v23 = vunpack.i.h.bf16 %v1498_v22  ;;  %v1499_v24 = vunpack.i.l.bf16 %v1498_v22  ;;  %v1505_v1 = vunpack.i.h.bf16 %v1503_v21  ;;  %v1504_v25 = vunpack.i.l.bf16 %v1503_v21 }
 0x20d   : > { %1354 = vmatprep.subr.msk.bf16.mxu1 %vm1352_vm13, %v1353_v18  ;;  %vm1364_vm13 = vmpackc.low %vm632_vm10, %vm1802_vm3 }
 0x20e   : > { %v804_v0 = vsel %vm610_vm7, %v1500_v23, %v1499_v24  ;;  %v807_v26 = vsel %vm610_vm7, %v1499_v24, 0.0  ;;  %1357 = vmatpush1.bf16.msk.msra.mxu1 %vm1355_vm14, %v1356_v19  ;;  %v814_v36 = vsel %vm2141_vm11, %v1505_v1, %v1504_v25  ;;  %v817_v37 = vsel %vm2141_vm11, %v1504_v25, 0.0  ;;  %vm1367_vm14 = vmpackc.low %vm1630_vm15, %vm1798_vm1 }
 0x20f   : > { %v1359_v28 = vpack.c.bf16 %v807_v26, %v1873_v46  ;;  %v1362_v29 = vpack.c.bf16 %v804_v0, %v1871_v45  ;;  %v1513_v30 = vpop.permute.xlu0 %1512  ;;  %v1508_v31 = vpop.permute.xlu1 %1507  ;;  %vm849_vm11 = vcmask 588800   ;;  %v996_v0 = vld [vmem:[%s2113_s10] sm:$0x3] }
 0x210   : > { %v1515_v32 = vunpack.i.h.bf16 %v1513_v30  ;;  %v1514_v33 = vunpack.i.l.bf16 %v1513_v30  ;;  %v1510_v34 = vunpack.i.h.bf16 %v1508_v31  ;;  %v1509_v35 = vunpack.i.l.bf16 %v1508_v31 }
 0x211   : > { %1360 = vmatprep.subr.msk.bf16.mxu1 %vm1358_vm8, %v1359_v28  ;;  %vm2171_vm8 = vcmask 1043456  }
 0x212   : > { %v835_v38 = vsel %vm640_vm12, %v1515_v32, 0.0  ;;  %v1365_v39 = vpack.c.bf16 %v1510_v34, %v817_v37  ;;  %v824_v40 = vsel %vm632_vm10, %v1509_v35, %v1510_v34  ;;  %1363 = vmatpush1.bf16.msk.msra.mxu1 %vm1361_vm0, %v1362_v29  ;;  %v832_v41 = vsel %vm640_vm12, %v1514_v33, %v1515_v32  ;;  %vm2172_vm0 = vmmov %vm2171_vm8 }
 0x213   : > { %v837_v42 = vsel %vm1815_vm9, %v835_v38, 0.0  ;;  %v1368_v43 = vpack.c.bf16 %v824_v40, %v814_v36  ;;  %v836_v44 = vsel %vm1806_vm6, %v832_v41, 0.0 }
 0x214   : > { %v847_v47 = vpack.c.bf16 %v837_v42, %v837_v42  ;;  %1366 = vmatprep.subr.msk.bf16.mxu1 %vm1364_vm13, %v1365_v39  ;;  %v846_v48 = vpack.c.bf16 %v836_v44, %v836_v44 }
 0x216   : > { %1369 = vmatpush1.bf16.msk.msra.mxu1 %vm1367_vm14, %v1368_v43  ;;  %v854_v49 = vsel %vm2172_vm0, %v846_v48, 0  ;;  %v1073_v48 = vld [vmem:[%s2117_s14] sm:$0xff] }
 0x217   : > { %1370 = vmatprep.subr.msk.bf16.mxu1 %vm2171_vm8, %v847_v47  ;;  %vm923_vm8 = vcmask 31744   ;;  %v1074_v47 = vld [vmem:[%s2118_s15] sm:$0xff] }
 0x21a   : > { %868 = vmatpush1.bf16.msra.mxu1 %v854_v49 }
 0x21d   : > { %1371 = vmatmul.mubr.msk.bf16.vlgmr.msra.gmra.mrb[0].mxu1 %vm849_vm11, %v848_v50  ;;  %vm2173_vm11 = vcmask 1041408  }
 0x21e   : > { %1229 = vmatprep.mubr.bf16.mxu1 %v1629_v4  ;;  %vm2174_vm14 = vmmov %vm2173_vm11 }
 0x220   : > { %v903_v51 = vpop.permute.xlu1 %902  ;;  %v910_v55 = vpop.permute.xlu0 %909 }
 0x224   : > { %v978_v8 = vpop.permute.xlu1 %977  ;;  %v986_v12 = vpop.permute.xlu0 %985 }
 0x228   : > { %v1053_v26 = vpop.permute.xlu1 %1052  ;;  %v1061_v31 = vpop.permute.xlu0 %1060 }
 0x2f0   : > { %v893_v52 = vpop.f32.mrb[0].mxu1 }
 0x2f1   : > { %v905_v53 = vmul.f32 %v903_v51, %v893_v52  ;;  %v895_v54 = vpop.f32.mrb[1].mxu1 }
 0x2f2   : > { %v906_v56 = vmul.f32 %v903_v51, %v895_v54  ;;  %v897_v57 = vpop.f32.mrb[2].mxu1 }
 0x2f3   : > { %v912_v58 = vadd.f32 %v910_v55, %v905_v53  ;;  %v898_v59 = vpop.f32.mrb[3].mxu1 }
 0x2f4   : > { %v913_v60 = vadd.f32 %v910_v55, %v906_v56 }
 0x2f5   : > { %vm914_vm15 = vcmp.gt.f32.partialorder %v912_v58, 0.0  ;;  %v916_v61 = vmul.f32 0.2, %v912_v58 }
 0x2f6   : > { %vm915_vm13 = vcmp.gt.f32.partialorder %v913_v60, 0.0  ;;  %v917_v62 = vmul.f32 0.2, %v913_v60 }
 0x2f7   : > { %v918_v63 = vsel %vm914_vm15, %v912_v58, %v916_v61 }
 0x2f8   : > { %v919_v2 = vsel %vm915_vm13, %v913_v60, %v917_v62  ;;  %v921_v3 = vpack.c.bf16 %v918_v63, %v918_v63  ;;  %vm2175_vm13 = vmmov %vm2173_vm11 }
 0x2f9   : > { %v922_v5 = vpack.c.bf16 %v919_v2, %v919_v2 }
 0x2fa   : > { %v928_v6 = vsel %vm2173_vm11, %v921_v3, 0 }
 0x2fb   : > { %1372 = vmatprep.subr.msk.bf16.mxu0 %vm2174_vm14, %v922_v5 }
 0x2fc   : > { %934 = vmatpush1.bf16.msra.mxu0 %v928_v6 }
 0x2ff   : > { %1373 = vmatmul.mubr.msk.bf16.vlgmr.msra.gmra.mrb[4].mxu0 %vm923_vm8, %v920_v7 }
 0x300   : > { %1040 = vmatprep.mubr.bf16.mxu0 %v1629_v4 }
 0x3d2   : > { %v967_v9 = vpop.f32.mrb[4].mxu0 }
 0x3d3   : > { %v980_v10 = vmul.f32 %v978_v8, %v967_v9  ;;  %v969_v11 = vpop.f32.mrb[5].mxu0 }
 0x3d4   : > { %v981_v14 = vmul.f32 %v978_v8, %v969_v11  ;;  %v971_v16 = vpop.f32.mrb[6].mxu0 }
 0x3d5   : > { %v988_v17 = vadd.f32 %v986_v12, %v980_v10  ;;  %v972_v18 = vpop.f32.mrb[7].mxu0 }
 0x3d6   : > { %v989_v19 = vadd.f32 %v986_v12, %v981_v14 }
 0x3d7   : > { %vm990_vm0 = vcmp.gt.f32.partialorder %v988_v17, 0.0  ;;  %v992_v21 = vmul.f32 0.2, %v988_v17 }
 0x3d8   : > { %vm991_vm15 = vcmp.gt.f32.partialorder %v989_v19, 0.0  ;;  %v993_v22 = vmul.f32 0.2, %v989_v19 }
 0x3d9   : > { %v994_v23 = vsel %vm990_vm0, %v988_v17, %v992_v21 }
 0x3da   : > { %v995_v24 = vsel %vm991_vm15, %v989_v19, %v993_v22  ;;  %v997_v1 = vpack.c.bf16 %v994_v23, %v994_v23 }
 0x3db   : > { %v998_v25 = vpack.c.bf16 %v995_v24, %v995_v24 }
 0x3dc   : > { %v1003_v4 = vsel %vm2175_vm13, %v997_v1, 0 }
 0x3dd   : > { %1374 = vmatprep.subr.msk.bf16.mxu0 %vm2173_vm11, %v998_v25 }
 0x3de   : > { %1009 = vmatpush1.bf16.msra.mxu0 %v1003_v4 }
 0x3e1   : > { %1375 = vmatmul.mubr.msk.bf16.vlgmr.msra.gmra.mrb[8].mxu0 %vm923_vm8, %v996_v0 }
 0x4b4   : > { %v1042_v28 = vpop.f32.mrb[8].mxu0 }
 0x4b5   : > { %v1055_v29 = vmul.f32 %v1053_v26, %v1042_v28  ;;  %v1044_v30 = vpop.f32.mrb[9].mxu0 }
 0x4b6   : > { %v1056_v32 = vmul.f32 %v1053_v26, %v1044_v30  ;;  %v1046_v33 = vpop.f32.mrb[10].mxu0 }
 0x4b7   : > { %v1063_v34 = vadd.f32 %v1061_v31, %v1055_v29  ;;  %v1047_v35 = vpop.f32.mrb[11].mxu0 }
 0x4b8   : > { %v1064_v36 = vadd.f32 %v1061_v31, %v1056_v32 }
 0x4b9   : > { %vm1065_vm14 = vcmp.gt.f32.partialorder %v1063_v34, 0.0  ;;  %v1067_v37 = vmul.f32 0.2, %v1063_v34 }
 0x4ba   : > { %vm1066_vm0 = vcmp.gt.f32.partialorder %v1064_v36, 0.0  ;;  %v1068_v38 = vmul.f32 0.2, %v1064_v36 }
 0x4bb   : > { %v1069_v39 = vsel %vm1065_vm14, %v1063_v34, %v1067_v37 }
 0x4bc   : > { %v1976_v40 = vadd.f32 %v1069_v39, %v918_v63  ;;  %v1070_v41 = vsel %vm1066_vm0, %v1064_v36, %v1068_v38 }
 0x4bd   : > { %v1978_v42 = vadd.f32 %v1070_v41, %v919_v2 }
 0x4bf   : > { %v1521_v43 = vpack.i.bf16 %v1978_v42, %v1976_v40  ;;  %v1541_v44 = vpack.i.bf16 %v1976_v40, %v1978_v42 }
 0x4c1   : > { %1522 = vrot.lane.b32.xlu0 %v1521_v43, %s2176_s28  ;;  %1517 = vrot.lane.b32.xlu1 %v1521_v43, %s2165_s19  ;;  %s1561_s19 = sshll.u32 %s1631_s21, 4  ;;  %s1562_s19 = int_to_ptr.vmem [resolvable:$false] %s1561_s19 }
 0x4c2   : > { %s1563_s27 = scalar_lea.vmem %s1562_s19, 512 }
 0x4c5   : > { %1532 = vrot.lane.b32.xlu0 %v1521_v43, %s2166_s26  ;;  %1527 = vrot.lane.b32.xlu1 %v1521_v43, %s2177_s29 }
 0x4c9   : > { %1542 = vrot.lane.b32.xlu0 %v1541_v44, %s2168_s18  ;;  %1537 = vrot.lane.b32.xlu1 %v1541_v44, %s2167_s23  ;;  %s512_s18 = sand.u32 1, %s1611_s22  }
 0x4ca   : > { %s1340_s30 = sshll.u32 %s512_s18, 4  ;;  %s1263_s25 = scalar_lea.sflag [#allocation3], %s512_s18 }
 0x4cb   : > { %s514_s20 = scalar_lea.vmem [#allocation2], %s1340_s30 }
 0x4cc   : > { %s1277_s28 = sshll.u32 %s514_s20, 4  ;;  %s2063_s28 = int_to_ptr.vmem [resolvable:$true] %s1277_s28 }
 0x4cd   : > { %1552 = vrot.lane.b32.xlu0 %v1521_v43, %s2178_s1  ;;  %1547 = vrot.lane.b32.xlu1 %v1541_v44, %s2179_s2  ;;  %s2061_s2 = scalar_lea.hbm %s2119_s16, %s1384_s17  ;;  %s1557_s3 = scalar_lea.vmem %s2063_s28, 256 }
 0x4ce   : > { %p1558_p11 = scmp.ne.s32.totalorder %s2063_s28, %s1557_s3  ;;  %p1564_p0 = scmp.lt.s32.totalorder %s2063_s28, %s1562_s19 }
 0x4cf   : > { %p1565_p1 = scmp.lt.s32.totalorder %s1563_s27, %s1557_s3 }
 0x4d0   : > { %p1559_p12 = pnand %p1558_p11, %p1755_p5 }
 0x4d1   : > { %1247 = vperm.xlu0 %1474, %v1074_v47   ;;  %1240 = vperm.xlu1 %1475, %v1073_v48   ;;  %p1566_p2 = por %p1565_p1, %p1564_p0 }
 0x4d2   : > { %p1560_p13 = pneg %p1559_p12 }
 0x4d4   : > { %p1567_p3 = pnand %p1566_p2, %p1560_p13 }
 0x533   : > { %v1523_v49 = vpop.permute.xlu0 %1522  ;;  %v1518_v50 = vpop.permute.xlu1 %1517 }
 0x534   : > { %v1525_v51 = vunpack.i.h.bf16 %v1523_v49  ;;  %v1524_v52 = vunpack.i.l.bf16 %v1523_v49  ;;  %v1520_v53 = vunpack.i.h.bf16 %v1518_v50  ;;  %v1519_v54 = vunpack.i.l.bf16 %v1518_v50 }
 0x536   : > { %v1093_v55 = vsel %vm574_vm5, 0.0, %v1524_v52  ;;  %v1111_v56 = vsel %vm599_vm2, 0.0, %v1519_v54  ;;  %v1091_v57 = vsel %vm574_vm5, %v1524_v52, %v1525_v51  ;;  %v1108_v58 = vsel %vm599_vm2, %v1519_v54, %v1520_v53 }
 0x537   : > { %v1533_v59 = vpop.permute.xlu0 %1532  ;;  %v1528_v60 = vpop.permute.xlu1 %1527  ;;  %v1112_v61 = vsel %vm1798_vm1, %v1111_v56, 0.0  ;;  %v1152_v2 = vrot.slane %v1093_v55, 4  ;;  %v1153_v6 = vrot.slane %v1091_v57, 4  ;;  %v1113_v7 = vsel %vm1802_vm3, %v1108_v58, 0.0 }
 0x538   : > { %v1535_v62 = vunpack.i.h.bf16 %v1533_v59  ;;  %v1534_v63 = vunpack.i.l.bf16 %v1533_v59  ;;  %v1530_v3 = vunpack.i.h.bf16 %v1528_v60  ;;  %v1529_v5 = vunpack.i.l.bf16 %v1528_v60 }
 0x539   : > { %v1158_v10 = vrot.slane %v1112_v61, 4  ;;  %vm2180_vm2 = vcmask 138240   ;;  %v1159_v23 = vrot.slane %v1113_v7, 4 }
 0x53a   : > { %v1098_v8 = vsel %vm582_vm4, %v1534_v63, %v1535_v62  ;;  %v1101_v9 = vsel %vm582_vm4, 0.0, %v1534_v63  ;;  %v1081_v12 = vsel %vm2180_vm2, %v1529_v5, %v1530_v3  ;;  %vm2181_vm5 = vmmov %vm2180_vm2  ;;  %vm2182_vm4 = vcmask 1043456  }
 0x53b   : > { %v1102_v11 = vsel %vm1806_vm6, %v1101_v9, 0.0  ;;  %v1084_v14 = vsel %vm2181_vm5, 0.0, %v1529_v5  ;;  %v1543_v16 = vpop.permute.xlu0 %1542  ;;  %v1538_v17 = vpop.permute.xlu1 %1537  ;;  %v1103_v22 = vsel %vm1815_vm9, %v1098_v8, 0.0  ;;  %v1086_v25 = vsel %vm1802_vm3, %v1081_v12, 0.0  ;;  %vm2183_vm8 = vmmov %vm2182_vm4 }
 0x53c   : > { %v1085_v18 = vsel %vm1798_vm1, %v1084_v14, 0.0  ;;  %v1545_v19 = vunpack.i.h.bf16 %v1543_v16  ;;  %v1544_v21 = vunpack.i.l.bf16 %v1543_v16  ;;  %v1540_v24 = vunpack.i.h.bf16 %v1538_v17  ;;  %vm2184_vm15 = vmmov %vm2182_vm4 }
 0x53d   : > { %v1539_v1 = vunpack.i.l.bf16 %v1538_v17  ;;  %v1175_v4 = vsel %vm2182_vm4, %v1102_v11, %v1158_v10  ;;  %v1173_v0 = vsel %vm2183_vm8, %v1085_v18, %v1152_v2  ;;  %v1174_v33 = vsel %vm2184_vm15, %v1086_v25, %v1153_v6  ;;  %vm2185_vm13 = vmmov %vm2182_vm4 }
 0x53e   : > { %v1138_v26 = vsel %vm632_vm10, %v1545_v19, %v1544_v21  ;;  %v1140_v28 = vsel %vm632_vm10, %v1544_v21, 0.0  ;;  %v1176_v34 = vsel %vm2185_vm13, %v1103_v22, %v1159_v23  ;;  %v1181_v50 = vpack.c.bf16 %v1175_v4, %v1173_v0  ;;  %vm2189_vm11 = vmmov %vm2182_vm4 }
 0x53f   : > { %v1118_v29 = vsel %vm610_vm7, %v1540_v24, %v1539_v1  ;;  %v1121_v30 = vsel %vm610_vm7, %v1539_v1, 0.0  ;;  %v1553_v31 = vpop.permute.xlu0 %1552  ;;  %v1548_v32 = vpop.permute.xlu1 %1547  ;;  %v1182_v49 = vpack.c.bf16 %v1176_v34, %v1174_v33  ;;  %v1169_v51 = vrot.slane %v1138_v26, 4  ;;  %vm2190_vm14 = vmmov %vm2182_vm4 }
 0x540   : > { %v1122_v35 = vsel %vm1806_vm6, %v1118_v29, 0.0  ;;  %v1123_v36 = vsel %vm1815_vm9, %v1121_v30, 0.0  ;;  %v1555_v37 = vunpack.i.h.bf16 %v1553_v31  ;;  %v1554_v38 = vunpack.i.l.bf16 %v1553_v31  ;;  %vm2191_vm0 = vmmov %vm2182_vm4 }
 0x541   : > { %v1164_v39 = vrot.slane %v1122_v35, 4  ;;  %v1165_v41 = vrot.slane %v1123_v36, 4  ;;  %v1550_v43 = vunpack.i.h.bf16 %v1548_v32  ;;  %v1549_v44 = vunpack.i.l.bf16 %v1548_v32  ;;  %1197 = vmatprep.subr.bf16.mxu1 %v1182_v49 }
 0x542   : > { %v1148_v47 = vsel %vm640_vm12, %v1555_v37, 0.0  ;;  %v1145_v48 = vsel %vm640_vm12, %v1554_v38, %v1555_v37  ;;  %v1170_v52 = vrot.slane %v1140_v28, 4  ;;  %vm2186_vm7 = vcmask 924672   ;;  %vm2188_vm12 = vmmov %vm2182_vm4  ;;  %1198 = vmatpush1.bf16.msra.mxu1 %v1181_v50 }
 0x543   : > { %v1128_v53 = vsel %vm2186_vm7, %v1550_v43, %v1549_v44  ;;  %vm2187_vm10 = vmmov %vm2186_vm7  ;;  %v1150_v55 = vsel %vm1815_vm9, %v1148_v47, 0.0  ;;  %v1178_v58 = vsel %vm2188_vm12, %v1978_v42, %v1165_v41  ;;  %v1177_v60 = vsel %vm2190_vm14, %v1976_v40, %v1164_v39  ;;  %v1187_v40 = vld [vmem:[%s2116_s13] sm:$0xf] }
 0x544   : > { %v1131_v54 = vsel %vm2187_vm10, %v1549_v44, 0.0  ;;  %v1132_v56 = vsel %vm1798_vm1, %v1128_v53, 0.0  ;;  %v1149_v13 = vsel %vm1806_vm6, %v1145_v48, 0.0  ;;  %v1186_v15 = vpack.c.bf16 %v1150_v55, %v1150_v55 }
 0x545   : > { %v1133_v57 = vsel %vm1802_vm3, %v1131_v54, 0.0  ;;  %v1179_v27 = vsel %vm2191_vm0, %v1132_v56, %v1169_v51  ;;  %v1185_v63 = vpack.c.bf16 %v1149_v13, %v1149_v13  ;;  %vm2192_vm1 = vcmask 1041408  }
 0x546   : > { %v1180_v59 = vsel %vm2189_vm11, %v1133_v57, %v1170_v52  ;;  %v1183_v62 = vpack.c.bf16 %v1179_v27, %v1177_v60  ;;  %vm2193_vm3 = vmmov %vm2192_vm1  ;;  %vm2194_vm9 = vcmask 293888  }
 0x547   : > { %v1184_v61 = vpack.c.bf16 %v1180_v59, %v1178_v58  ;;  %v1192_v42 = vsel %vm2193_vm3, %v1185_v63, 0 }
 0x549   : > { %1199 = vmatprep.subr.bf16.mxu1 %v1184_v61 }
 0x54a   : > { %1200 = vmatpush1.bf16.msra.mxu1 %v1183_v62 }
 0x54b   : > { %1376 = vmatprep.subr.msk.bf16.mxu1 %vm2192_vm1, %v1186_v15 }
 0x54e   : > { %1202 = vmatpush1.bf16.msra.mxu1 %v1192_v42 }
 0x550   : > { %v1241_v20 = vpop.permute.xlu1 %1240  ;;  %v1248_v6 = vpop.permute.xlu0 %1247 }
 0x551   : > { %1377 = vmatmul.mubr.msk.bf16.vlgmr.msra.gmra.mrb[4].mxu1 %vm2194_vm9, %v1187_v40 }
 0x624   : > { %v1231_v2 = vpop.f32.mrb[4].mxu1 }
 0x625   : > { %v1243_v3 = vmul.f32 %v1241_v20, %v1231_v2  ;;  %v1233_v5 = vpop.f32.mrb[5].mxu1 }
 0x626   : > { %v1244_v7 = vmul.f32 %v1241_v20, %v1233_v5  ;;  %v1235_v8 = vpop.f32.mrb[6].mxu1 }
 0x627   : > { %v1250_v9 = vadd.f32 %v1248_v6, %v1243_v3  ;;  %v1236_v10 = vpop.f32.mrb[7].mxu1 }
 0x628   : > { %v1251_v11 = vadd.f32 %v1248_v6, %v1244_v7 }
 0x629   : > { %vm1252_vm6 = vcmp.gt.f32.partialorder %v1250_v9, 0.0  ;;  %v1254_v12 = vmul.f32 0.2, %v1250_v9 }
 0x62a   : > { %vm1253_vm2 = vcmp.gt.f32.partialorder %v1251_v11, 0.0  ;;  %v1255_v14 = vmul.f32 0.2, %v1251_v11 }
 0x62b   : > { %v1256_v16 = vsel %vm1252_vm6, %v1250_v9, %v1254_v12 }
 0x62c   : > { %v1257_v17 = vsel %vm1253_vm2, %v1251_v11, %v1255_v14  ;;  %v1258_v18 = vadd.f32 %v1256_v16, %v1871_v45 }
 0x62d   : > { %v1259_v19 = vadd.f32 %v1257_v17, %v1873_v46 }
 0x62e   : > { %1260 = vst [vmem:[%s514_s20] sm:$0xff] %v1258_v18 }
 0x62f   : > { %1261 = vst [vmem:[%s514_s20 + $0x8] sm:$0xff] %v1259_v19 }
 0x630   : > { %1570 = shalt.err (!%p1567_p3)
}
 0x631   : > { %s1571_s26 = scalar_lea.hbm %s2061_s2, 256  ;;  %s1575_s30 = scalar_lea.hbm %s2119_s16, 512 }
 0x632   : > { %p1572_p4 = scmp.ne.s32.totalorder %s2061_s2, %s1571_s26  ;;  %p1576_p9 = scmp.lt.u32.totalorder %s2061_s2, %s2119_s16 }
 0x633   : > { %p1577_p10 = scmp.lt.u32.totalorder %s1575_s30, %s1571_s26  ;;  %p1579_p12 = scmp.lt.u32.totalorder %s1571_s26, %s2061_s2 }
 0x634   : > { %p1573_p7 = pnand %p1572_p4, %p1755_p5 }
 0x635   : > { %p1578_p11 = por %p1577_p10, %p1576_p9 }
 0x636   : > { %p1574_p8 = pneg %p1573_p7 }
 0x637   : > { %p1580_p13 = por %p1579_p12, %p1578_p11 }
 0x639   : > { %p1581_p0 = pnand %p1580_p13, %p1574_p8 }
 0x63b   : > { %1584 = shalt.err (!%p1581_p0)
}
 0x63c   : > { %1385 = dma.vmem_to_hbm [thread:$0]  (%p1755_p5), %s2063_s28, 256, %s2061_s2, %s1263_s25  }
 0x63d PF: > { %s2195_s29 = sld [smem:[#allocation5_spill]]  ;;  %p1391_p1 = scmp.ge.s32.totalorder %s1619_s24, 2 }
 0x63f   : > { %p1388_p2 = pnand %p1391_p1, %p1759_p6 }
 0x643   : > { %s1289_s3 = sand.u32 1, %s2195_s29  }
 0x644   : > { %s1290_s21 = scalar_lea.sflag [#allocation3], %s1289_s3 }
 0x645   : > { %1602 = dma.done.wait (!%p1388_p2), %s1290_s21, 256  }
 0x646   : > { %1604 = vsyncadd (!%p1388_p2), %s1290_s21, 4294967040  ;;  %s2197_s24 = sld [smem:[#allocation7_spill]]  ;;  %s2198_s19 = sld [smem:[#allocation6_spill]] }
 0x647   : > { %s2199_s23 = sld [smem:[#allocation8_spill]]  ;;  %s2200_s21 = smov %s1611_s22 }
 0x64c   : > { %p26_p3 = scmp.ge.s32.totalorder %s2197_s24, 4   ;;  %s2201_s22 = smov %s2198_s19 }
 0x64e   :  { %28 = sbr.rel (!%p26_p3) target bundleno = 8 (0x8), region = 119 }
 0x655   :  { %1295 = vsyncpa [#allocation3], 1 }
 0x656   :  { %1297 = vsyncpa [#allocation3 + $0x1], 1 }

</bundles_post_ra>
